<compile_context>
chip_gen: v7x
topology: tpu7x:2x2x1
jax: 0.10.0
libtpu: 0.0.40
codegen_flags: <defaults>
</compile_context>

<pallas_src>
import numpy as np
import jax
import jax.numpy as jnp
from jax.experimental import pallas as pl
from jax.experimental.pallas import tpu as pltpu

C1 = 0.01 ** 2
C2 = 0.03 ** 2


# ----------------------------- window helpers -------------------------------
def _gauss_1d(window_size: int, sigma: float) -> np.ndarray:
    x = np.linspace(-(window_size // 2), window_size // 2, window_size).astype(np.float64)
    g = np.exp(-(x ** 2) / (2.0 * sigma ** 2))
    return (g / g.sum()).astype(np.float32)


def _band_matrix(n: int, g: np.ndarray) -> np.ndarray:
    """M[i, j] = g[j - i + pad] inside the band, 0 outside.

    M @ x == 1-D zero-padded "same" correlation of each column of x with g,
    i.e. exactly what F.conv2d(padding=K//2) does along one spatial axis.
    """
    K = len(g)
    pad = K // 2
    m = np.zeros((n, n), np.float32)
    for i in range(n):
        for t in range(K):
            j = i + t - pad
            if 0 <= j < n:
                m[i, j] = g[t]
    return m


# --------------------------------- kernel -----------------------------------
def _ssim_kernel(gh_ref, gw_ref, x_ref, y_ref, o_ref):
    bc, H, W = x_ref.shape
    x = x_ref[...].astype(jnp.float32)            # (bc, H, W)
    y = y_ref[...].astype(jnp.float32)
    gw = gw_ref[...]                              # (W, W) right-multiply band
    # Broadcast once and reuse for all 5 blurs (JAX does not CSE broadcasts).
    ghb = jnp.broadcast_to(gh_ref[...], (bc, H, H))   # (bc, H, H)

    hi = jax.lax.Precision.HIGHEST

    def blur(a):                                  # (bc, H, W) -> (bc, H, W)
        # Horizontal pass: all rows of the block batched into one MXU matmul.
        h = jnp.dot(a.reshape(bc * H, W), gw,
                    precision=hi, preferred_element_type=jnp.float32)
        h = h.reshape(bc, H, W)
        # Vertical pass: batched MXU matmul (no transposes, no lane shifts).
        return jnp.einsum("bik,bkw->biw", ghb, h,
                          precision=hi, preferred_element_type=jnp.float32)

    mu1 = blur(x)
    mu2 = blur(y)
    mu1_mu2 = mu1 * mu2
    mu1_sq = mu1 * mu1
    mu2_sq = mu2 * mu2

    # Fold sigma terms into num/den as soon as they are produced to keep the
    # number of live full-size temporaries small.
    sigma12 = blur(x * y) - mu1_mu2
    num = (2.0 * mu1_mu2 + C1) * (2.0 * sigma12 + C2)
    sigma1_sq = blur(x * x) - mu1_sq
    sigma2_sq = blur(y * y) - mu2_sq
    den = (mu1_sq + mu2_sq + C1) * (sigma1_sq + sigma2_sq + C2)
    ssim_map = num / den                          # (bc, H, W)

    row = jnp.sum(ssim_map, axis=2)               # (bc, H)
    per_bc = jnp.sum(row, axis=1, keepdims=True)  # (bc, 1) partial sums
    o_ref[...] = per_bc[None]                     # (1, bc, 1)


# -------------------------------- wrapper ------------------------------------
def _pick_bc_tile(bc_total: int, H: int, W: int, budget_bytes: int = 8 << 20) -> int:
    # Roughly ~10 live f32 (H, W) slabs per image-channel in a block (two
    # double-buffered inputs + blur temporaries).  Keep each block well inside
    # the 32 MiB scoped-VMEM default so the same tiling holds on v7x (64 MiB
    # physical) as well as v5e/v6e (128 MiB).
    per_image = H * W * 4 * 10
    cap = max(1, min(budget_bytes // max(per_image, 1), 4))
    best = 1
    for d in range(1, bc_total + 1):
        if bc_total % d == 0 and d <= cap:
            best = d
    return best


def ssim_metric(img1, img2, window_size: int = 11, sigma: float = 1.5,
                reduction: str = "mean"):
    assert img1.shape == img2.shape and img1.ndim == 4
    B, C, H, W = img1.shape
    BC = B * C

    # Window is rebuilt from (window_size, sigma) so non-default sizes work.
    g = _gauss_1d(window_size, sigma)
    gh = jnp.asarray(_band_matrix(H, g))          # (H, H) left band
    gw = jnp.asarray(_band_matrix(W, g).T)        # (W, W) right band (symmetric)

    # Flatten batch*channel; inputs keep their HBM dtype (cast in-kernel).
    x = img1.reshape(BC, H, W)
    y = img2.reshape(BC, H, W)

    bc_tile = _pick_bc_tile(BC, H, W)
    nb = BC // bc_tile

    grid_spec = pltpu.PrefetchScalarGridSpec(
        num_scalar_prefetch=0,
        grid=(nb,),
        in_specs=[
            pl.BlockSpec((H, H), lambda i: (0, 0)),            # G_H (resident)
            pl.BlockSpec((W, W), lambda i: (0, 0)),            # G_W (resident)
            pl.BlockSpec((bc_tile, H, W), lambda i: (i, 0, 0)),  # img1 slice
            pl.BlockSpec((bc_tile, H, W), lambda i: (i, 0, 0)),  # img2 slice
        ],
        out_specs=pl.BlockSpec((1, bc_tile, 1), lambda i: (i, 0, 0)),
    )

    est = (bc_tile * H * W * 4) * 12 + (H * H + W * W) * 4 * 2
    params = pltpu.CompilerParams(
        dimension_semantics=("parallel",),            # megacore shard on v7x
        vmem_limit_bytes=int(min(100 << 20, max(32 << 20, 2 * est))),
    )

    sums = pl.pallas_call(
        _ssim_kernel,
        out_shape=jax.ShapeDtypeStruct((nb, bc_tile, 1), jnp.float32),
        grid_spec=grid_spec,
        compiler_params=params,
    )(gh, gw, x, y)

    # Hierarchical means: mean over (H, W) -> mean over C -> mean over B.
    per_channel = sums.reshape(B, C) / float(H * W)
    per_image = per_channel.mean(axis=1)
    if reduction == "mean":
        return per_image.mean()
    return per_image


# --------------------------- pure-JAX reference -------------------------------
def _ssim_ref(img1, img2, window_size: int = 11, sigma: float = 1.5):
    B, C, H, W = img1.shape
    g = jnp.asarray(_gauss_1d(window_size, sigma))
    k2d = jnp.outer(g, g)
    kern = jnp.broadcast_to(k2d, (C, 1, window_size, window_size))

    def conv(a):
        return jax.lax.conv_general_dilated(
            a, kern, window_strides=(1, 1), padding="SAME",
            feature_group_count=C,
            dimension_numbers=("NCHW", "OIHW", "NCHW"),
            precision=jax.lax.Precision.HIGHEST)

    mu1, mu2 = conv(img1), conv(img2)
    s1 = conv(img1 * img1) - mu1 * mu1
    s2 = conv(img2 * img2) - mu2 * mu2
    s12 = conv(img1 * img2) - mu1 * mu2
    num = (2 * mu1 * mu2 + C1) * (2 * s12 + C2)
    den = (mu1 * mu1 + mu2 * mu2 + C1) * (s1 + s2 + C2)
    m = num / den
    return m.mean(axis=(2, 3)).mean(axis=1).mean()


# ---------------------------------- main --------------------------------------
if __name__ == "__main__":
    key = jax.random.PRNGKey(0)
    k1, k2 = jax.random.split(key)
    B, C, H, W = 2, 3, 16, 16          # channel=3 as in the module default
    img1 = jax.random.uniform(k1, (B, C, H, W), jnp.float32)
    img2 = jax.random.uniform(k2, (B, C, H, W), jnp.float32)

    out = jax.block_until_ready(ssim_metric(img1, img2))
    ref = jax.block_until_ready(_ssim_ref(img1, img2))
    np.testing.assert_allclose(np.asarray(out), np.asarray(ref),
                               rtol=2e-4, atol=1e-5)
    print("KERNEL_OK")
</pallas_src>

<mosaic_0001>
module attributes {stable_mosaic.version = 11 : i64} {
  func.func @_ssim_kernel(%arg0: i32, %arg1: memref<16x16xf32, #tpu.memory_space<vmem>>, %arg2: memref<16x16xf32, #tpu.memory_space<vmem>>, %arg3: memref<3x16x16xf32, #tpu.memory_space<vmem>>, %arg4: memref<3x16x16xf32, #tpu.memory_space<vmem>>, %arg5: memref<1x3x1xf32, #tpu.memory_space<vmem>>) attributes {dimension_semantics = [#tpu.dimension_semantics<parallel>], iteration_bounds = array<i64: 2>, scalar_prefetch = 0 : i64, scratch_operands = 0 : i64, tpu.core_type = #tpu.core_type<tc>, window_params = [{pipeline_mode = #tpu.pipeline_mode<synchronous>, transform_indices = @transform_0, window_bounds = array<i64: 16, 16>}, {pipeline_mode = #tpu.pipeline_mode<synchronous>, transform_indices = @transform_1, window_bounds = array<i64: 16, 16>}, {transform_indices = @transform_2, window_bounds = array<i64: 3, 16, 16>}, {transform_indices = @transform_3, window_bounds = array<i64: 3, 16, 16>}, {transform_indices = @transform_4, window_bounds = array<i64: 1, 3, 1>}]} {
    %c0 = arith.constant 0 : index
    %c0_0 = arith.constant 0 : index
    %c0_1 = arith.constant 0 : index
    %0 = vector.load %arg3[%c0, %c0_0, %c0_1] : memref<3x16x16xf32, #tpu.memory_space<vmem>>, vector<3x16x16xf32>
    %c0_2 = arith.constant 0 : index
    %c0_3 = arith.constant 0 : index
    %c0_4 = arith.constant 0 : index
    %1 = vector.load %arg4[%c0_2, %c0_3, %c0_4] : memref<3x16x16xf32, #tpu.memory_space<vmem>>, vector<3x16x16xf32>
    %c0_5 = arith.constant 0 : index
    %c0_6 = arith.constant 0 : index
    %2 = vector.load %arg2[%c0_5, %c0_6] : memref<16x16xf32, #tpu.memory_space<vmem>>, vector<16x16xf32>
    %c0_7 = arith.constant 0 : index
    %c0_8 = arith.constant 0 : index
    %3 = vector.load %arg1[%c0_7, %c0_8] : memref<16x16xf32, #tpu.memory_space<vmem>>, vector<16x16xf32>
    %4 = vector.shape_cast %3 : vector<16x16xf32> to vector<1x16x16xf32>
    %5 = vector.broadcast %4 : vector<1x16x16xf32> to vector<3x16x16xf32>
    %6 = vector.shape_cast %0 : vector<3x16x16xf32> to vector<48x16xf32>
    %cst = arith.constant dense<0.000000e+00> : vector<48x16xf32>
    %7 = tpu.matmul %6, %2, %cst {dimension_numbers = #tpu.dot_dimension_numbers<[1], [0], [0], [1], [0, 0, 1, 1], [], []>, precision = #tpu.contract_precision<fp32>} : vector<48x16xf32>, vector<16x16xf32>, vector<48x16xf32> -> vector<48x16xf32>
    %8 = vector.shape_cast %7 : vector<48x16xf32> to vector<3x16x16xf32>
    "tpu.trace_start"() <{level = 10 : i32, message = "bik,bkw->biw"}> : () -> ()
    %cst_9 = arith.constant dense<0.000000e+00> : vector<3x16x16xf32>
    %9 = tpu.matmul %5, %8, %cst_9 {dimension_numbers = #tpu.dot_dimension_numbers<[2], [1], [1], [2], [0, 0, 0, 1, 1, 2], [0], [0]>, precision = #tpu.contract_precision<fp32>} : vector<3x16x16xf32>, vector<3x16x16xf32>, vector<3x16x16xf32> -> vector<3x16x16xf32>
    "tpu.trace_stop"() : () -> ()
    %10 = vector.shape_cast %1 : vector<3x16x16xf32> to vector<48x16xf32>
    %cst_10 = arith.constant dense<0.000000e+00> : vector<48x16xf32>
    %11 = tpu.matmul %10, %2, %cst_10 {dimension_numbers = #tpu.dot_dimension_numbers<[1], [0], [0], [1], [0, 0, 1, 1], [], []>, precision = #tpu.contract_precision<fp32>} : vector<48x16xf32>, vector<16x16xf32>, vector<48x16xf32> -> vector<48x16xf32>
    %12 = vector.shape_cast %11 : vector<48x16xf32> to vector<3x16x16xf32>
    "tpu.trace_start"() <{level = 10 : i32, message = "bik,bkw->biw"}> : () -> ()
    %cst_11 = arith.constant dense<0.000000e+00> : vector<3x16x16xf32>
    %13 = tpu.matmul %5, %12, %cst_11 {dimension_numbers = #tpu.dot_dimension_numbers<[2], [1], [1], [2], [0, 0, 0, 1, 1, 2], [0], [0]>, precision = #tpu.contract_precision<fp32>} : vector<3x16x16xf32>, vector<3x16x16xf32>, vector<3x16x16xf32> -> vector<3x16x16xf32>
    "tpu.trace_stop"() : () -> ()
    %14 = arith.mulf %9, %13 : vector<3x16x16xf32>
    %15 = arith.mulf %9, %9 : vector<3x16x16xf32>
    %16 = arith.mulf %13, %13 : vector<3x16x16xf32>
    %17 = arith.mulf %0, %1 : vector<3x16x16xf32>
    %18 = vector.shape_cast %17 : vector<3x16x16xf32> to vector<48x16xf32>
    %cst_12 = arith.constant dense<0.000000e+00> : vector<48x16xf32>
    %19 = tpu.matmul %18, %2, %cst_12 {dimension_numbers = #tpu.dot_dimension_numbers<[1], [0], [0], [1], [0, 0, 1, 1], [], []>, precision = #tpu.contract_precision<fp32>} : vector<48x16xf32>, vector<16x16xf32>, vector<48x16xf32> -> vector<48x16xf32>
    %20 = vector.shape_cast %19 : vector<48x16xf32> to vector<3x16x16xf32>
    "tpu.trace_start"() <{level = 10 : i32, message = "bik,bkw->biw"}> : () -> ()
    %cst_13 = arith.constant dense<0.000000e+00> : vector<3x16x16xf32>
    %21 = tpu.matmul %5, %20, %cst_13 {dimension_numbers = #tpu.dot_dimension_numbers<[2], [1], [1], [2], [0, 0, 0, 1, 1, 2], [0], [0]>, precision = #tpu.contract_precision<fp32>} : vector<3x16x16xf32>, vector<3x16x16xf32>, vector<3x16x16xf32> -> vector<3x16x16xf32>
    "tpu.trace_stop"() : () -> ()
    %22 = arith.subf %21, %14 : vector<3x16x16xf32>
    %cst_14 = arith.constant 2.000000e+00 : f32
    %23 = vector.broadcast %cst_14 : f32 to vector<3x16x16xf32>
    %24 = arith.mulf %23, %14 : vector<3x16x16xf32>
    %cst_15 = arith.constant 9.99999974E-5 : f32
    %25 = vector.broadcast %cst_15 : f32 to vector<3x16x16xf32>
    %26 = arith.addf %24, %25 : vector<3x16x16xf32>
    %cst_16 = arith.constant 2.000000e+00 : f32
    %27 = vector.broadcast %cst_16 : f32 to vector<3x16x16xf32>
    %28 = arith.mulf %27, %22 : vector<3x16x16xf32>
    %cst_17 = arith.constant 8.99999984E-4 : f32
    %29 = vector.broadcast %cst_17 : f32 to vector<3x16x16xf32>
    %30 = arith.addf %28, %29 : vector<3x16x16xf32>
    %31 = arith.mulf %26, %30 : vector<3x16x16xf32>
    %32 = arith.mulf %0, %0 : vector<3x16x16xf32>
    %33 = vector.shape_cast %32 : vector<3x16x16xf32> to vector<48x16xf32>
    %cst_18 = arith.constant dense<0.000000e+00> : vector<48x16xf32>
    %34 = tpu.matmul %33, %2, %cst_18 {dimension_numbers = #tpu.dot_dimension_numbers<[1], [0], [0], [1], [0, 0, 1, 1], [], []>, precision = #tpu.contract_precision<fp32>} : vector<48x16xf32>, vector<16x16xf32>, vector<48x16xf32> -> vector<48x16xf32>
    %35 = vector.shape_cast %34 : vector<48x16xf32> to vector<3x16x16xf32>
    "tpu.trace_start"() <{level = 10 : i32, message = "bik,bkw->biw"}> : () -> ()
    %cst_19 = arith.constant dense<0.000000e+00> : vector<3x16x16xf32>
    %36 = tpu.matmul %5, %35, %cst_19 {dimension_numbers = #tpu.dot_dimension_numbers<[2], [1], [1], [2], [0, 0, 0, 1, 1, 2], [0], [0]>, precision = #tpu.contract_precision<fp32>} : vector<3x16x16xf32>, vector<3x16x16xf32>, vector<3x16x16xf32> -> vector<3x16x16xf32>
    "tpu.trace_stop"() : () -> ()
    %37 = arith.subf %36, %15 : vector<3x16x16xf32>
    %38 = arith.mulf %1, %1 : vector<3x16x16xf32>
    %39 = vector.shape_cast %38 : vector<3x16x16xf32> to vector<48x16xf32>
    %cst_20 = arith.constant dense<0.000000e+00> : vector<48x16xf32>
    %40 = tpu.matmul %39, %2, %cst_20 {dimension_numbers = #tpu.dot_dimension_numbers<[1], [0], [0], [1], [0, 0, 1, 1], [], []>, precision = #tpu.contract_precision<fp32>} : vector<48x16xf32>, vector<16x16xf32>, vector<48x16xf32> -> vector<48x16xf32>
    %41 = vector.shape_cast %40 : vector<48x16xf32> to vector<3x16x16xf32>
    "tpu.trace_start"() <{level = 10 : i32, message = "bik,bkw->biw"}> : () -> ()
    %cst_21 = arith.constant dense<0.000000e+00> : vector<3x16x16xf32>
    %42 = tpu.matmul %5, %41, %cst_21 {dimension_numbers = #tpu.dot_dimension_numbers<[2], [1], [1], [2], [0, 0, 0, 1, 1, 2], [0], [0]>, precision = #tpu.contract_precision<fp32>} : vector<3x16x16xf32>, vector<3x16x16xf32>, vector<3x16x16xf32> -> vector<3x16x16xf32>
    "tpu.trace_stop"() : () -> ()
    %43 = arith.subf %42, %16 : vector<3x16x16xf32>
    %44 = arith.addf %15, %16 : vector<3x16x16xf32>
    %cst_22 = arith.constant 9.99999974E-5 : f32
    %45 = vector.broadcast %cst_22 : f32 to vector<3x16x16xf32>
    %46 = arith.addf %44, %45 : vector<3x16x16xf32>
    %47 = arith.addf %37, %43 : vector<3x16x16xf32>
    %cst_23 = arith.constant 8.99999984E-4 : f32
    %48 = vector.broadcast %cst_23 : f32 to vector<3x16x16xf32>
    %49 = arith.addf %47, %48 : vector<3x16x16xf32>
    %50 = arith.mulf %46, %49 : vector<3x16x16xf32>
    %51 = arith.divf %31, %50 : vector<3x16x16xf32>
    %cst_24 = arith.constant dense<0.000000e+00> : vector<3x16xf32>
    %52 = vector.multi_reduction <add>, %51, %cst_24 [2] : vector<3x16x16xf32> to vector<3x16xf32>
    %cst_25 = arith.constant dense<0.000000e+00> : vector<3xf32>
    %53 = vector.multi_reduction <add>, %52, %cst_25 [1] : vector<3x16xf32> to vector<3xf32>
    %54 = vector.shape_cast %53 : vector<3xf32> to vector<3x1xf32>
    %55 = vector.shape_cast %54 : vector<3x1xf32> to vector<1x3x1xf32>
    %c0_26 = arith.constant 0 : index
    %c0_27 = arith.constant 0 : index
    %c0_28 = arith.constant 0 : index
    %56 = vector.load %arg5[%c0_26, %c0_27, %c0_28] : memref<1x3x1xf32, #tpu.memory_space<vmem>>, vector<1x3x1xf32>
    tpu.vector_store %arg5[%c0_26, %c0_27, %c0_28], %55 {strides = array<i32>} : memref<1x3x1xf32, #tpu.memory_space<vmem>>, vector<1x3x1xf32>,
    return
  }
  func.func @transform_0(%arg0: i32) -> (i32, i32) {
    %c0_i32 = arith.constant 0 : i32
    %c0_i32_0 = arith.constant 0 : i32
    %c0_i32_1 = arith.constant 0 : i32
    return %c0_i32, %c0_i32_0 : i32, i32
  }
  func.func @transform_1(%arg0: i32) -> (i32, i32) {
    %c0_i32 = arith.constant 0 : i32
    %c0_i32_0 = arith.constant 0 : i32
    %c0_i32_1 = arith.constant 0 : i32
    return %c0_i32, %c0_i32_0 : i32, i32
  }
  func.func @transform_2(%arg0: i32) -> (i32, i32, i32) {
    %c0_i32 = arith.constant 0 : i32
    %c0_i32_0 = arith.constant 0 : i32
    %c0_i32_1 = arith.constant 0 : i32
    return %arg0, %c0_i32, %c0_i32_0 : i32, i32, i32
  }
  func.func @transform_3(%arg0: i32) -> (i32, i32, i32) {
    %c0_i32 = arith.constant 0 : i32
    %c0_i32_0 = arith.constant 0 : i32
    %c0_i32_1 = arith.constant 0 : i32
    return %arg0, %c0_i32, %c0_i32_0 : i32, i32, i32
  }
  func.func @transform_4(%arg0: i32) -> (i32, i32, i32) {
    %c0_i32 = arith.constant 0 : i32
    %c0_i32_0 = arith.constant 0 : i32
    %c0_i32_1 = arith.constant 0 : i32
    return %arg0, %c0_i32, %c0_i32_0 : i32, i32, i32
  }
}

</mosaic_0001>

<bundles_post_ra>
// kernel: tpu_custom_call.1
= control target key start
LH: loop header
LB: loop body
LE: loop exit
PB: predicated region body
PF: predicated region fallthrough
CT: control target
= control target key end

     0   :  { %9 = vsyncpa [#allocation3], 0  ;;  %s15632_s0 = inlined_call_operand.hbm [shape: f32[16,16], index: 0, kind: input, shape index: {}]   ;;  %s15633_s1 = inlined_call_operand.hbm [shape: f32[16,16], index: 1, kind: input, shape index: {}]   ;;  %s15634_s2 = inlined_call_operand.hbm [shape: f32[6,16,16], index: 2, kind: input, shape index: {}]   ;;  %s15635_s3 = inlined_call_operand.hbm [shape: f32[6,16,16], index: 3, kind: input, shape index: {}]   ;;  %s15636_s4 = inlined_call_operand.vmem [shape: f32[2,3,1], index: 4, kind: output, shape index: {}]  }
   0x1   :  { %10 = vsyncpa [#allocation5], 0  ;;  %s14287_s15 = smov 0   ;;  %s14289_s16 = smov 0  }
   0x2   :  { %s14291_s17 = smov 0   ;;  %s14293_s18 = smov 0  }
   0x3 LB: > { %s14306_s19 = sadd.s32 4294967295, %s14254_s18   ;;  %s14309_s20 = sadd.s32 1, %s14254_s18   ;;  %s14254_s18 = sphi %s14293_s18, %s15659_s18   ;;  %s14250_s17 = sphi %s14291_s17, %s15658_s17   ;;  %s14246_s16 = sphi %s14289_s16, %s15657_s16   ;;  %s14242_s15 = sphi %s14287_s15, %s15656_s15  }
   0x4   : > { %s62_s21 = ssub.s32 %s14254_s18, %s14309_s20  ;;  %s65_s22 = sadd.s32 1, %s14250_s17 }
   0x5   : > { %p63_p0 = scmp.eq.s32.totalorder %s62_s21, 0  ;;  %p72_p1 = scmp.ne.s32.totalorder %s14250_s17, %s14246_s16 }
   0x6   : > { %p73_p2 = scmp.eq.s32.totalorder %s14254_s18, 0  ;;  %p78_p3 = scmp.ne.s32.totalorder %s14246_s16, %s14242_s15 }
   0x7   : > { %s14319_s23 = scalar_select %p63_p0, %s14250_s17, %s65_s22  }
   0x8   : > { %p14321_p4 = por %p73_p2, %p72_p1  ;;  %p15637_p5 = scmp.eq.s32.totalorder %s14306_s19, 0 }
   0x9   : > { %p11594_p6 = scmp.ge.s32.totalorder %s14254_s18, 1  ;;  %p141_p7 = scmp.lt.s32.totalorder %s14254_s18, 3 }
   0xa   : > { %p14330_p8 = por %p15637_p5, %p78_p3  ;;  %s14256_s27 = smov [#allocation2]  }
   0xb   : > { %p14334_p9 = pnand %p11594_p6, %p141_p7  ;;  %s153_s28 = sshll.u32 %s14256_s27, 4  ;;  %s154_s28 = int_to_ptr.vmem [resolvable:$true] %s153_s28 }
   0xc   : > { %s15643_s25 = scalar_select %p14330_p8, 1, 0 }
   0xd   : > { %s15644_s26 = scalar_select %p14334_p9, 1, 0 }
   0xe   : > { %p14029_p10 = pneg %p14334_p9  ;;  %p14045_p12 = scmp.lt.s32.totalorder %s14254_s18, 2 }
   0xf   : > { %s180_s30 = sand.u32 1, %s14254_s18   ;;  %s182_s5 = sand.u32 1, %s14250_s17  }
  0x10   : > { %p14342_p11 = pnand %p14029_p10, %p15637_p5  ;;  %p14351_p13 = pnand %p14045_p12, %p14321_p4 }
  0x11   : > { %s14096_s9 = scalar_lea.hbm %s15632_s0, 256 }
  0x12   : > { %s15646_s6 = scalar_select %p14351_p13, 1, 0 }
  0x13   : > { %p14097_p0 = scmp.ne.s32.totalorder %s15632_s0, %s14096_s9  ;;  %p15641_p1 = pneg %p14342_p11 }
  0x14   : > { %p14103_p4 = scmp.lt.u32.totalorder %s14096_s9, %s15632_s0 }
  0x15   : > { %p14099_p2 = pnand %p15641_p1, %p14097_p0 }
  0x17   : > { %p14100_p3 = pneg %p14099_p2 }
  0x19   : > { %p14105_p6 = pnand %p14103_p4, %p14100_p3 }
  0x1b   : > { %14108 = shalt.err (!%p14105_p6)
}
  0x1c   : > { %s14109_s14 = scalar_lea.vmem %s154_s28, 256  ;;  %p14117_p5 = scmp.lt.s32.totalorder %s154_s28, %s154_s28 }
  0x1d   : > { %p14110_p7 = scmp.ne.s32.totalorder %s154_s28, %s14109_s14  ;;  %p14118_p8 = scmp.lt.s32.totalorder %s14109_s14, %s14109_s14 }
  0x1f   : > { %p14112_p10 = pnand %p14110_p7, %p15641_p1  ;;  %p14119_p9 = por %p14118_p8, %p14117_p5 }
  0x21   : > { %p14113_p12 = pneg %p14112_p10 }
  0x23   : > { %p14120_p13 = pnand %p14119_p9, %p14113_p12 }
  0x25   : > { %14123 = shalt.err (!%p14120_p13)
}
  0x26   : > { %s14257_s15 = smov 128   ;;  %s14258_s21 = smov 8  }
  0x27   : > { %14032 = dma.hbm_to_vmem [thread:$0]  (!%p14342_p11), %s15632_s0, 256, %s154_s28, [#allocation3], %s14257_s15, %s14257_s15, %s14258_s21  }
  0x28   : > { %s14380_s27 = smul.u32 48, %s182_s5  ;;  %s14259_s8 = smov [#allocation4]  }
  0x29   : > { %s11612_s7 = smul.u32 768, %s14254_s18  ;;  %s166_s9 = sshll.u32 %s14259_s8, 4  ;;  %s14383_s9 = int_to_ptr.vmem [resolvable:$true] %s166_s9 }
  0x2a   : > { %s184_s13 = scalar_lea.vmem [#allocation6], %s14380_s27  ;;  %s14397_s5 = scalar_lea.sflag [#allocation3], %s180_s30 }
  0x2b   : > { %s14390_s12 = scalar_lea.hbm %s15634_s2, %s11612_s7  ;;  %s192_s28 = sshll.u32 %s184_s13, 4  ;;  %s14393_s28 = int_to_ptr.vmem [resolvable:$true] %s192_s28 }
  0x2c   : > { %s14124_s14 = scalar_lea.hbm %s14390_s12, 768  ;;  %p15647_p8 = scmp.ne.s32.totalorder %s15646_s6, 0 }
  0x2d   : > { %p14125_p5 = scmp.ne.s32.totalorder %s14390_s12, %s14124_s14  ;;  %s14129_s8 = scalar_lea.hbm %s15634_s2, 1536 }
  0x2e   : > { %p14126_p9 = pneg %p15647_p8  ;;  %p14130_p2 = scmp.lt.u32.totalorder %s14390_s12, %s15634_s2 }
  0x2f   : > { %p14131_p3 = scmp.lt.u32.totalorder %s14129_s8, %s14124_s14  ;;  %p14133_p6 = scmp.lt.u32.totalorder %s14124_s14, %s14390_s12 }
  0x30   : > { %p14127_p13 = pnand %p14126_p9, %p14125_p5 }
  0x31   : > { %p14132_p4 = por %p14131_p3, %p14130_p2 }
  0x32   : > { %p14128_p0 = pneg %p14127_p13 }
  0x33   : > { %p14134_p7 = por %p14133_p6, %p14132_p4 }
  0x35   : > { %p14135_p10 = pnand %p14134_p7, %p14128_p0 }
  0x37   : > { %14138 = shalt.err (!%p14135_p10)
}
  0x38   : > { %s14139_s30 = scalar_lea.vmem %s14393_s28, 768  ;;  %s14260_s13 = smov [#allocation6]  }
  0x39   : > { %p14140_p12 = scmp.ne.s32.totalorder %s14393_s28, %s14139_s30  ;;  %s14144_s22 = sshll.u32 %s14260_s13, 4  ;;  %s14145_s22 = int_to_ptr.vmem [resolvable:$false] %s14144_s22 }
  0x3a   : > { %s14146_s24 = scalar_lea.vmem %s14145_s22, 1536  ;;  %p14147_p1 = scmp.lt.s32.totalorder %s14393_s28, %s14145_s22 }
  0x3b   : > { %p14142_p5 = pnand %p14140_p12, %p14126_p9  ;;  %p14148_p2 = scmp.lt.s32.totalorder %s14146_s24, %s14139_s30 }
  0x3d   : > { %p14143_p13 = pneg %p14142_p5  ;;  %p14149_p3 = por %p14148_p2, %p14147_p1 }
  0x3f   : > { %p14150_p4 = pnand %p14149_p3, %p14143_p13 }
  0x41   : > { %14153 = shalt.err (!%p14150_p4)
}
  0x42   : > { %14039 = dma.hbm_to_vmem [thread:$0]  (!%p15647_p8), %s14390_s12, 768, %s14393_s28, %s14397_s5, %s14257_s15, %s14257_s15, %s14258_s21  }
  0x43   : > { %s14154_s10 = scalar_lea.hbm %s15633_s1, 256  ;;  %p15648_p0 = pneg %p14342_p11 }
  0x44   : > { %p14155_p1 = scmp.ne.s32.totalorder %s15633_s1, %s14154_s10  ;;  %p14161_p10 = scmp.lt.u32.totalorder %s14154_s10, %s15633_s1 }
  0x46   : > { %p14157_p6 = pnand %p14155_p1, %p15648_p0 }
  0x48   : > { %p14158_p7 = pneg %p14157_p6 }
  0x4a   : > { %p14163_p12 = pnand %p14161_p10, %p14158_p7 }
  0x4c   : > { %14166 = shalt.err (!%p14163_p12)
}
  0x4d   : > { %s14167_s12 = scalar_lea.vmem %s14383_s9, 256  ;;  %p15649_p13 = pmov %p15648_p0 }
  0x4e   : > { %p14168_p5 = scmp.ne.s32.totalorder %s14383_s9, %s14167_s12  ;;  %p14175_p4 = scmp.lt.s32.totalorder %s14383_s9, %s14383_s9 }
  0x4f   : > { %p14176_p1 = scmp.lt.s32.totalorder %s14167_s12, %s14167_s12 }
  0x50   : > { %p14170_p2 = pnand %p14168_p5, %p15649_p13 }
  0x51   : > { %p14177_p0 = por %p14176_p1, %p14175_p4 }
  0x52   : > { %p14171_p3 = pneg %p14170_p2 }
  0x54   : > { %p14178_p6 = pnand %p14177_p0, %p14171_p3 }
  0x56   : > { %14181 = shalt.err (!%p14178_p6)
}
  0x57   : > { %14035 = dma.hbm_to_vmem [thread:$0]  (!%p14342_p11), %s15633_s1, 256, %s14383_s9, [#allocation5], %s14257_s15, %s14257_s15, %s14258_s21  }
  0x58   : > { %s14461_s10 = scalar_lea.hbm %s15635_s3, %s11612_s7  ;;  %s206_s29 = scalar_lea.vmem [#allocation7], %s14380_s27 }
  0x59   : > { %s214_s11 = sshll.u32 %s206_s29, 4  ;;  %s14182_s13 = scalar_lea.hbm %s14461_s10, 768  ;;  %s14464_s11 = int_to_ptr.vmem [resolvable:$true] %s214_s11 }
  0x5a   : > { %p14183_p7 = scmp.ne.s32.totalorder %s14461_s10, %s14182_s13  ;;  %s14187_s30 = scalar_lea.hbm %s15635_s3, 1536 }
  0x5b   : > { %p14188_p12 = scmp.lt.u32.totalorder %s14461_s10, %s15635_s3  ;;  %p14189_p5 = scmp.lt.u32.totalorder %s14187_s30, %s14182_s13 }
  0x5c   : > { %p14185_p10 = pnand %p14183_p7, %p14126_p9  ;;  %p14191_p2 = scmp.lt.u32.totalorder %s14182_s13, %s14461_s10 }
  0x5d   : > { %p14190_p13 = por %p14189_p5, %p14188_p12 }
  0x5e   : > { %p14186_p11 = pneg %p14185_p10 }
  0x5f   : > { %p14192_p3 = por %p14191_p2, %p14190_p13 }
  0x61   : > { %p14193_p4 = pnand %p14192_p3, %p14186_p11 }
  0x63   : > { %14196 = shalt.err (!%p14193_p4)
}
  0x64   : > { %s14197_s27 = scalar_lea.vmem %s14464_s11, 768  ;;  %s14261_s12 = smov [#allocation7]  }
  0x65   : > { %p14198_p1 = scmp.ne.s32.totalorder %s14464_s11, %s14197_s27  ;;  %s14202_s28 = sshll.u32 %s14261_s12, 4  ;;  %s14203_s28 = int_to_ptr.vmem [resolvable:$false] %s14202_s28 }
  0x66   : > { %s14204_s24 = scalar_lea.vmem %s14203_s28, 1536  ;;  %p14205_p7 = scmp.lt.s32.totalorder %s14464_s11, %s14203_s28 }
  0x67   : > { %p14200_p0 = pnand %p14198_p1, %p14126_p9  ;;  %p14206_p10 = scmp.lt.s32.totalorder %s14204_s24, %s14197_s27 }
  0x69   : > { %p14201_p6 = pneg %p14200_p0  ;;  %p14207_p12 = por %p14206_p10, %p14205_p7 }
  0x6b   : > { %p14208_p5 = pnand %p14207_p12, %p14201_p6 }
  0x6d   : > { %14211 = shalt.err (!%p14208_p5)
}
  0x6e   : > { %14042 = dma.hbm_to_vmem [thread:$0]  (!%p15647_p8), %s14461_s10, 768, %s14464_s11, %s14397_s5, %s14257_s15, %s14257_s15, %s14258_s21  }
  0x6f   : > { %p15650_p9 = scmp.ne.s32.totalorder %s15644_s26, 0 }
  0x70   : > { %p15651_p11 = scmp.eq.s32.totalorder (!%p15650_p9), %s14306_s19, 0 }
  0x71   : > { %226 = sbr.rel (%p15650_p9) target bundleno = 1605 (0x645), region = 36 }
  0x78   : > { %14229 = dma.done.wait (%p15651_p11), [#allocation3], 256   ;;  %p15652_p13 = pmov %p15651_p11 }
  0x79   : > { %p15653_p2 = pmov %p15651_p11 }
  0x7a   : > { %14231 = vsyncadd (%p15652_p13), [#allocation3], 4294967040 }
  0x7b   : > { %14233 = dma.done.wait (%p15653_p2), [#allocation5], 256   ;;  %p15654_p3 = pmov %p15653_p2 }
  0x7c   : > { %s236_s6 = sand.u32 1, %s14306_s19   ;;  %s238_s15 = sand.u32 1, %s14246_s16  }
  0x7d   : > { %14235 = vsyncadd (%p15654_p3), [#allocation5], 4294967040  ;;  %s14016_s21 = smul.u32 48, %s238_s15  ;;  %s237_s26 = scalar_lea.sflag [#allocation3], %s236_s6 }
  0x7e   : > { %p15655_p8 = scmp.ne.s32.totalorder %s15643_s25, 0 }
  0x7f   : > { %s14505_s5 = scalar_lea.vmem [#allocation6], %s14016_s21 }
  0x80   : > { %14237 = dma.done.wait (%p15655_p8), %s237_s26, 1536  }
  0x81   : > { %14239 = vsyncadd (%p15655_p8), %s237_s26, 4294965760  ;;  %vm300_vm0 = vcmask 130048   ;;  %v296_v0 = vld [vmem:[#allocation4] sm:$0xff]  ;;  %v297_v1 = vld [vmem:[#allocation4 + $0x8] sm:$0xff]  ;;  %s14519_s14 = scalar_lea.vmem [#allocation7], %s14016_s21  ;;  %vm11458_vm1 = vcmask 130112  }
  0x82   : > { %v14512_v2 = vld [vmem:[%s14505_s5] sm:$0xff]  ;;  %v320_v3 = vand.u32 4294901760, %v296_v0  ;;  %v323_v4 = vand.u32 4294901760, %v297_v1  ;;  %v14517_v6 = vld [vmem:[%s14505_s5 + $0x8] sm:$0xff]  ;;  %v14533_v11 = vld [vmem:[%s14505_s5 + $0x10] sm:$0xff]  ;;  %vm11478_vm2 = vcmask 1041409  }
  0x83   : > { %v302_v5 = vsel %vm300_vm0, %v14512_v2, 0  ;;  %v14522_v7 = vld [vmem:[%s14519_s14 + $0x8] sm:$0xff]  ;;  %v305_v9 = vsel %vm300_vm0, %v14517_v6, 0  ;;  %v14536_v12 = vld [vmem:[%s14505_s5 + $0x18] sm:$0xff]  ;;  %v308_v16 = vsel %vm300_vm0, %v14533_v11, 0  ;;  %v14550_v18 = vld [vmem:[%s14505_s5 + $0x20] sm:$0xff] }
  0x84   : > { %v14524_v8 = vand.u32 4294901760, %v302_v5  ;;  %v14530_v10 = vmul.f32 %v14522_v7, %v14517_v6  ;;  %v14538_v13 = vpack.c.bf16 %v323_v4, %v320_v3  ;;  %v14540_v14 = vand.u32 4294901760, %v305_v9  ;;  %v14563_v24 = vld [vmem:[%s14505_s5 + $0x28] sm:$0xff]  ;;  %v14608_v60 = vld [vmem:[%s14519_s14] sm:$0xff]  ;;  %v14614_v62 = vld [vmem:[%s14519_s14 + $0x10] sm:$0xff]  ;;  %p280_p4 = scmp.lt.s32.totalorder %s14306_s19, 1 }
  0x85   : > { %v311_v17 = vsel %vm300_vm0, %v14536_v12, 0  ;;  %v14556_v20 = vand.u32 4294901760, %v308_v16  ;;  %v448_v23 = vsub.f32 %v296_v0, %v320_v3  ;;  %v455_v27 = vsub.f32 %v297_v1, %v323_v4  ;;  %v14627_v3 = vld [vmem:[%s14519_s14 + $0x18] sm:$0xff]  ;;  %v14630_v4 = vld [vmem:[%s14519_s14 + $0x20] sm:$0xff] }
  0x86   : > { %v14543_v15 = vsub.f32 %v302_v5, %v14524_v8  ;;  %13235 = vmatprep.subr.bf16.mxu0 %v14538_v13  ;;  %v14554_v19 = vsub.f32 %v305_v9, %v14540_v14  ;;  %v14560_v22 = vand.u32 4294901760, %v311_v17  ;;  %v314_v28 = vsel %vm300_vm0, %v14550_v18, 0  ;;  %s15661_s19 = smov (!%p280_p4, %s14306_s19), 1 }
  0x87   : > { %13237 = vmatpush3.bf16.msra.mxu0 %v14538_v13  ;;  %v407_v26 = vsub.f32 %v308_v16, %v14556_v20  ;;  %v449_v31 = vand.u32 4294901760, %v448_v23  ;;  %v14573_v32 = vand.u32 4294901760, %v314_v28  ;;  %v456_v35 = vand.u32 4294901760, %v455_v27  ;;  %s11605_s25 = sshll.u32 %s15661_s19, 2 }
  0x88   : > { %v388_v21 = vand.u32 4294901760, %v14543_v15  ;;  %v398_v25 = vand.u32 4294901760, %v14554_v19  ;;  %v417_v30 = vsub.f32 %v311_v17, %v14560_v22  ;;  %v317_v36 = vsel %vm300_vm0, %v14563_v24, 0  ;;  %s283_s29 = scalar_lea.vmem %s15636_s4, %s11605_s25 }
  0x89   : > { %v408_v34 = vand.u32 4294901760, %v407_v26  ;;  %v450_v39 = vsub.f32 %v448_v23, %v449_v31  ;;  %v427_v40 = vsub.f32 %v314_v28, %v14573_v32  ;;  %v457_v43 = vsub.f32 %v455_v27, %v456_v35 }
  0x8a   : > { %v389_v29 = vsub.f32 %v14543_v15, %v388_v21  ;;  %v399_v33 = vsub.f32 %v14554_v19, %v398_v25  ;;  %v418_v38 = vand.u32 4294901760, %v417_v30  ;;  %v14579_v44 = vand.u32 4294901760, %v317_v36 }
  0x8b   : > { %v409_v42 = vsub.f32 %v407_v26, %v408_v34  ;;  %v451_v46 = vand.u32 4294901760, %v450_v39  ;;  %v428_v47 = vand.u32 4294901760, %v427_v40  ;;  %v458_v49 = vand.u32 4294901760, %v457_v43 }
  0x8c   : > { %v390_v37 = vand.u32 4294901760, %v389_v29  ;;  %v400_v41 = vand.u32 4294901760, %v399_v33  ;;  %v419_v45 = vsub.f32 %v417_v30, %v418_v38  ;;  %v437_v50 = vsub.f32 %v317_v36, %v14579_v44 }
  0x8d   : > { %v410_v48 = vand.u32 4294901760, %v409_v42  ;;  %v429_v52 = vsub.f32 %v427_v40, %v428_v47  ;;  %v14582_v53 = vpack.c.bf16 %v458_v49, %v451_v46  ;;  %v14584_v55 = vpack.c.bf16 %v455_v27, %v448_v23 }
  0x8e   : > { %12218 = vmatprep.mubr.f32.mxu0 %v390_v37  ;;  %v420_v51 = vand.u32 4294901760, %v419_v45  ;;  %v438_v54 = vand.u32 4294901760, %v437_v50  ;;  %v14598_v59 = vpack.c.bf16 %v456_v35, %v449_v31  ;;  %v2506_v61 = vsel %vm300_vm0, %v14608_v60, 0 }
  0x8f   : > { %12219 = vmatmul.mubr.f32.vlgmr.msra.gmra.mrb[0].mxu0 %v400_v41  ;;  %v430_v56 = vand.u32 4294901760, %v429_v52  ;;  %13239 = vmatprep.subr.bf16.mxu0 %v14582_v53  ;;  %v14619_v63 = vand.u32 4294901760, %v2506_v61  ;;  %v2509_v0 = vsel %vm300_vm0, %v14522_v7, 0  ;;  %v2512_v1 = vsel %vm300_vm0, %v14614_v62, 0 }
  0x90   : > { %12221 = vmatprep.mubr.f32.mxu0 %v410_v48  ;;  %v439_v57 = vsub.f32 %v437_v50, %v438_v54  ;;  %13241 = vmatpush3.bf16.msra.mxu0 %v14582_v53  ;;  %v14633_v5 = vand.u32 4294901760, %v2509_v0  ;;  %v2515_v16 = vsel %vm300_vm0, %v14627_v3, 0  ;;  %v2518_v17 = vsel %vm300_vm0, %v14630_v4, 0 }
  0x91   : > { %13243 = vmatprep.subr.bf16.mxu0 %v14584_v55  ;;  %v14637_v9 = vsub.f32 %v2506_v61, %v14619_v63  ;;  %v14650_v23 = vand.u32 4294901760, %v2515_v16  ;;  %v14655_v27 = vand.u32 4294901760, %v2518_v17  ;;  %v4723_v48 = vmul.f32 %v14614_v62, %v14533_v11 }
  0x92   : > { %v440_v58 = vand.u32 4294901760, %v439_v57  ;;  %v4731_v49 = vsel %vm300_vm0, %v14530_v10, 0  ;;  %vm11480_vm3 = vcmask 1042434   ;;  %vm11483_vm4 = vcmask 124928  }
  0x93   : > { %12222 = vmatmul.mubr.f32.gmra.mrb[2].mxu0 %v420_v51  ;;  %v4724_v51 = vmul.f32 %v14627_v3, %v14536_v12  ;;  %v4734_v52 = vsel %vm300_vm0, %v4723_v48, 0  ;;  %vm11487_vm5 = vcmask 2048  }
  0x94   : > { %12224 = vmatprep.mubr.f32.mxu0 %v430_v56  ;;  %v14706_v56 = vand.u32 4294901760, %v4731_v49  ;;  %v14713_v57 = vand.u32 4294901760, %v4734_v52 }
  0x97   : > { %12225 = vmatmul.mubr.f32.gmra.mrb[4].mxu0 %v440_v58  ;;  %v4737_v58 = vsel %vm300_vm0, %v4724_v51, 0 }
  0x98   : > { %12231 = vmatprep.mubr.f32.mxu0 %v14524_v8 }
  0x9b   : > { %12232 = vmatmul.mubr.f32.vlgmr.msra.gmra.mrb[0].mxu0 %v14540_v14 }
  0x9c   : > { %12234 = vmatprep.mubr.f32.mxu0 %v14556_v20  ;;  %13245 = vmatpush3.bf16.msra.mxu0 %v14584_v55 }
  0x9d   : > { %13247 = vmatprep.subr.bf16.mxu0 %v14538_v13 }
  0x9f   : > { %12235 = vmatmul.mubr.f32.gmra.mrb[2].mxu0 %v14560_v22 }
  0xa0   : > { %12237 = vmatprep.mubr.f32.mxu0 %v14573_v32 }
  0xa3   : > { %12238 = vmatmul.mubr.f32.gmra.mrb[4].mxu0 %v14579_v44 }
  0xa4   : > { %12244 = vmatprep.mubr.f32.mxu0 %v14543_v15  ;;  %v14639_v15 = vand.u32 4294901760, %v2512_v1 }
  0xa7   : > { %12245 = vmatmul.mubr.f32.vlgmr.msra.gmra.mrb[0].mxu0 %v14554_v19  ;;  %v14646_v19 = vld [vmem:[%s14519_s14 + $0x28] sm:$0xff] }
  0xa8   : > { %12247 = vmatprep.mubr.f32.mxu0 %v407_v26  ;;  %13249 = vmatpush3.bf16.msra.mxu0 %v14538_v13  ;;  %v2611_v26 = vsub.f32 %v2512_v1, %v14639_v15  ;;  %v2521_v28 = vsel %vm300_vm0, %v14646_v19, 0  ;;  %v4726_v61 = vmul.f32 %v14646_v19, %v14563_v24  ;;  %v14721_v1 = vsub.f32 %v4731_v49, %v14706_v56 }
  0xa9   : > { %13251 = vmatprep.subr.bf16.mxu0 %v14598_v59  ;;  %v14661_v31 = vand.u32 4294901760, %v2521_v28 }
  0xaa   : > { %v2612_v33 = vand.u32 4294901760, %v2611_v26 }
  0xab   : > { %12248 = vmatmul.mubr.f32.gmra.mrb[2].mxu0 %v417_v30  ;;  %v2621_v30 = vsub.f32 %v2515_v16, %v14650_v23  ;;  %v2641_v36 = vsub.f32 %v2521_v28, %v14661_v31 }
  0xac   : > { %12250 = vmatprep.mubr.f32.mxu0 %v427_v40 }
  0xad   : > { %v2642_v41 = vand.u32 4294901760, %v2641_v36 }
  0xaf   : > { %12251 = vmatmul.mubr.f32.gmra.mrb[4].mxu0 %v437_v50 }
  0xb0   : > { %12257 = vmatprep.mubr.f32.mxu0 %v388_v21  ;;  %v2601_v21 = vsub.f32 %v2509_v0, %v14633_v5 }
  0xb2   : > { %v2602_v29 = vand.u32 4294901760, %v2601_v21 }
  0xb3   : > { %12258 = vmatmul.mubr.f32.vlgmr.msra.gmra.mrb[0].mxu0 %v398_v25  ;;  %v2592_v25 = vand.u32 4294901760, %v14637_v9 }
  0xb4   : > { %12260 = vmatprep.mubr.f32.mxu0 %v408_v34  ;;  %13253 = vmatpush3.bf16.msra.mxu0 %v14598_v59  ;;  %v2631_v34 = vsub.f32 %v2518_v17, %v14655_v27  ;;  %v2603_v35 = vsub.f32 %v2601_v21, %v2602_v29  ;;  %v14728_v17 = vsub.f32 %v4734_v52, %v14713_v57 }
  0xb5   : > { %13255 = vmatprep.subr.bf16.mxu0 %v14538_v13 }
  0xb6   : > { %v2604_v39 = vand.u32 4294901760, %v2603_v35 }
  0xb7   : > { %12261 = vmatmul.mubr.f32.gmra.mrb[2].mxu0 %v418_v38  ;;  %v2613_v38 = vsub.f32 %v2611_v26, %v2612_v33 }
  0xb8   : > { %12263 = vmatprep.mubr.f32.mxu0 %v428_v47 }
  0xb9   : > { %v2614_v42 = vand.u32 4294901760, %v2613_v38 }
  0xbb   : > { %12264 = vmatmul.mubr.f32.gmra.mrb[4].mxu0 %v438_v54  ;;  %v4725_v54 = vmul.f32 %v14630_v4, %v14550_v18 }
  0xbc   : > { %12270 = vmatprep.mubr.f32.mxu0 %v14524_v8 }
  0xbd   : > { %v4740_v0 = vsel %vm300_vm0, %v4725_v54, 0 }
  0xbf   : > { %12271 = vmatmul.mubr.f32.vlgmr.msra.gmra.mrb[0].mxu0 %v14540_v14 }
  0xc0   : > { %12273 = vmatprep.mubr.f32.mxu0 %v14556_v20  ;;  %13257 = vmatpush3.bf16.msra.mxu0 %v14538_v13 }
  0xc1   : > { %13331 = vmatprep.subr.bf16.mxu0 %v14538_v13 }
  0xc3   : > { %12274 = vmatmul.mubr.f32.gmra.mrb[2].mxu0 %v14560_v22 }
  0xc4   : > { %12276 = vmatprep.mubr.f32.mxu0 %v14573_v32 }
  0xc7   : > { %12277 = vmatmul.mubr.f32.gmra.mrb[4].mxu0 %v14579_v44 }
  0xc8   : > { %12283 = vmatprep.mubr.f32.mxu0 %v14524_v8  ;;  %v2593_v8 = vsub.f32 %v14637_v9, %v2592_v25 }
  0xca   : > { %v2594_v37 = vand.u32 4294901760, %v2593_v8 }
  0xcb   : > { %12284 = vmatmul.mubr.f32.vlgmr.msra.gmra.mrb[0].mxu0 %v14540_v14  ;;  %v2622_v14 = vand.u32 4294901760, %v2621_v30 }
  0xcc   : > { %12286 = vmatprep.mubr.f32.mxu0 %v14556_v20  ;;  %13333 = vmatpush3.bf16.msra.mxu0 %v14538_v13  ;;  %v2632_v20 = vand.u32 4294901760, %v2631_v34 }
  0xcd   : > { %13335 = vmatprep.subr.bf16.mxu0 %v14582_v53  ;;  %v2623_v40 = vsub.f32 %v2621_v30, %v2622_v14 }
  0xce   : > { %v2633_v43 = vsub.f32 %v2631_v34, %v2632_v20 }
  0xcf   : > { %12287 = vmatmul.mubr.f32.gmra.mrb[2].mxu0 %v14560_v22  ;;  %v2624_v45 = vand.u32 4294901760, %v2623_v40  ;;  %v2643_v22 = vsub.f32 %v2641_v36, %v2642_v41 }
  0xd0   : > { %12289 = vmatprep.mubr.f32.mxu0 %v14573_v32  ;;  %v2634_v46 = vand.u32 4294901760, %v2633_v43 }
  0xd1   : > { %v2644_v32 = vand.u32 4294901760, %v2643_v22 }
  0xd3   : > { %12290 = vmatmul.mubr.f32.gmra.mrb[4].mxu0 %v14579_v44  ;;  %v4721_v44 = vmul.f32 %v14608_v60, %v14512_v2 }
  0xd4   : > { %12422 = vmatprep.mubr.f32.mxu0 %v2594_v37 }
  0xd5   : > { %v4728_v47 = vsel %vm300_vm0, %v4721_v44, 0  ;;  %v6961_v44 = vmul.f32 %v14512_v2, %v14512_v2  ;;  %v6963_v2 = vmul.f32 %v14533_v11, %v14533_v11  ;;  %v6965_v11 = vmul.f32 %v14550_v18, %v14550_v18 }
  0xd6   : > { %v14698_v50 = vand.u32 4294901760, %v4728_v47 }
  0xd7   : > { %12423 = vmatmul.mubr.f32.vlgmr.msra.gmra.mrb[6].mxu0 %v2604_v39  ;;  %v6968_v48 = vsel %vm300_vm0, %v6961_v44, 0  ;;  %v6974_v54 = vsel %vm300_vm0, %v6963_v2, 0 }
  0xd8   : > { %12425 = vmatprep.mubr.f32.mxu0 %v2614_v42  ;;  %13337 = vmatpush3.bf16.msra.mxu0 %v14582_v53  ;;  %v14711_v10 = vsub.f32 %v4728_v47, %v14698_v50  ;;  %v6962_v47 = vmul.f32 %v14517_v6, %v14517_v6  ;;  %v14800_v51 = vand.u32 4294901760, %v6968_v48  ;;  %v6964_v6 = vmul.f32 %v14536_v12, %v14536_v12 }
  0xd9   : > { %13339 = vmatprep.subr.bf16.mxu0 %v14584_v55  ;;  %v6966_v12 = vmul.f32 %v14563_v24, %v14563_v24 }
  0xda   : > { %v4814_v16 = vand.u32 4294901760, %v14711_v10  ;;  %v6971_v49 = vsel %vm300_vm0, %v6962_v47, 0 }
  0xdb   : > { %12426 = vmatmul.mubr.f32.gmra.mrb[8].mxu0 %v2624_v45  ;;  %v14807_v52 = vand.u32 4294901760, %v6971_v49  ;;  %v6983_v18 = vsel %vm300_vm0, %v6966_v12, 0 }
  0xdc   : > { %12428 = vmatprep.mubr.f32.mxu0 %v2634_v46 }
  0xdf   : > { %12429 = vmatmul.mubr.f32.gmra.mrb[10].mxu0 %v2644_v32 }
  0xe0   : > { %12435 = vmatprep.mubr.f32.mxu0 %v14619_v63 }
  0xe3   : > { %12436 = vmatmul.mubr.f32.vlgmr.msra.gmra.mrb[6].mxu0 %v14633_v5 }
  0xe4   : > { %12438 = vmatprep.mubr.f32.mxu0 %v14639_v15  ;;  %13341 = vmatpush3.bf16.msra.mxu0 %v14584_v55 }
  0xe5   : > { %13343 = vmatprep.subr.bf16.mxu0 %v14538_v13 }
  0xe7   : > { %12439 = vmatmul.mubr.f32.gmra.mrb[8].mxu0 %v14650_v23 }
  0xe8   : > { %12441 = vmatprep.mubr.f32.mxu0 %v14655_v27 }
  0xeb   : > { %12442 = vmatmul.mubr.f32.gmra.mrb[10].mxu0 %v14661_v31 }
  0xec   : > { %12448 = vmatprep.mubr.f32.mxu0 %v14637_v9  ;;  %v14723_v9 = vand.u32 4294901760, %v4737_v58 }
  0xee   : > { %v14736_v28 = vsub.f32 %v4737_v58, %v14723_v9  ;;  %v14815_v58 = vand.u32 4294901760, %v6974_v54 }
  0xef   : > { %12449 = vmatmul.mubr.f32.vlgmr.msra.gmra.mrb[6].mxu0 %v2601_v21  ;;  %v14730_v21 = vand.u32 4294901760, %v4740_v0 }
  0xf0   : > { %12451 = vmatprep.mubr.f32.mxu0 %v2611_v26  ;;  %13345 = vmatpush3.bf16.msra.mxu0 %v14538_v13  ;;  %v4824_v26 = vand.u32 4294901760, %v14721_v1 }
  0xf1   : > { %13347 = vmatprep.subr.bf16.mxu0 %v14598_v59  ;;  %v4853_v8 = vsub.f32 %v4740_v0, %v14730_v21  ;;  %v7063_v0 = vsub.f32 %v6971_v49, %v14807_v52 }
  0xf3   : > { %12452 = vmatmul.mubr.f32.gmra.mrb[8].mxu0 %v2621_v30  ;;  %v4834_v30 = vand.u32 4294901760, %v14728_v17  ;;  %v7064_v24 = vand.u32 4294901760, %v7063_v0 }
  0xf4   : > { %12454 = vmatprep.mubr.f32.mxu0 %v2631_v34 }
  0xf5   : > { %v4835_v35 = vsub.f32 %v14728_v17, %v4834_v30 }
  0xf7   : > { %12455 = vmatmul.mubr.f32.gmra.mrb[10].mxu0 %v2641_v36 }
  0xf8   : > { %12461 = vmatprep.mubr.f32.mxu0 %v2592_v25  ;;  %v4743_v25 = vsel %vm300_vm0, %v4726_v61, 0  ;;  %v6977_v61 = vsel %vm300_vm0, %v6964_v6, 0 }
  0xfb   : > { %12462 = vmatmul.mubr.f32.vlgmr.msra.gmra.mrb[6].mxu0 %v2602_v29  ;;  %v14738_v29 = vand.u32 4294901760, %v4743_v25 }
  0xfc   : > { %12464 = vmatprep.mubr.f32.mxu0 %v2612_v33  ;;  %13349 = vmatpush3.bf16.msra.mxu0 %v14598_v59  ;;  %v4844_v33 = vand.u32 4294901760, %v14736_v28 }
  0xfd   : > { %13351 = vmatprep.subr.bf16.mxu0 %v14538_v13 }
  0xfe   : > { %v4845_v37 = vsub.f32 %v14736_v28, %v4844_v33 }
  0xff   : > { %12465 = vmatmul.mubr.f32.gmra.mrb[8].mxu0 %v2622_v14  ;;  %v4854_v14 = vand.u32 4294901760, %v4853_v8 }
 0x100   : > { %12467 = vmatprep.mubr.f32.mxu0 %v2632_v20  ;;  %v298_v20 = vld [vmem:[#allocation2] sm:$0xff] }
 0x101   : > { %v4855_v39 = vsub.f32 %v4853_v8, %v4854_v14  ;;  %v994_v40 = vsel %vm300_vm0, %v298_v20, 0 }
 0x103   : > { %12468 = vmatmul.mubr.f32.gmra.mrb[10].mxu0 %v2642_v41  ;;  %v14757_v41 = vand.u32 4294901760, %v994_v40 }
 0x104   : > { %12474 = vmatprep.mubr.f32.mxu0 %v14619_v63 }
 0x105   : > { %v14760_v43 = vsub.f32 %v994_v40, %v14757_v41 }
 0x107   : > { %12475 = vmatmul.mubr.f32.vlgmr.msra.gmra.mrb[6].mxu0 %v14633_v5  ;;  %v14765_v45 = vand.u32 4294901760, %v14760_v43 }
 0x108   : > { %12477 = vmatprep.mubr.f32.mxu0 %v14639_v15  ;;  %13353 = vmatpush3.bf16.msra.mxu0 %v14538_v13 }
 0x109   : > { %13427 = vmatprep.subr.bf16.mxu0 %v14538_v13  ;;  %v1069_v46 = vsub.f32 %v14760_v43, %v14765_v45 }
 0x10b   : > { %12478 = vmatmul.mubr.f32.gmra.mrb[8].mxu0 %v14650_v23  ;;  %v14769_v32 = vand.u32 4294901760, %v1069_v46 }
 0x10c   : > { %12480 = vmatprep.mubr.f32.mxu0 %v14655_v27 }
 0x10d   : > { %12296 = vmatprep.mubr.f32.mxu1 %v14769_v32 }
 0x10f   : > { %12481 = vmatmul.mubr.f32.gmra.mrb[10].mxu0 %v14661_v31 }
 0x110   : > { %12487 = vmatprep.mubr.f32.mxu0 %v14619_v63  ;;  %v4815_v63 = vsub.f32 %v14711_v10, %v4814_v16 }
 0x112   : > { %v4816_v34 = vand.u32 4294901760, %v4815_v63  ;;  %v14835_v63 = vand.u32 4294901760, %v6983_v18 }
 0x113   : > { %12488 = vmatmul.mubr.f32.vlgmr.msra.gmra.mrb[6].mxu0 %v14633_v5  ;;  %v4825_v5 = vsub.f32 %v14721_v1, %v4824_v26 }
 0x114   : > { %12490 = vmatprep.mubr.f32.mxu0 %v14639_v15  ;;  %13429 = vmatpush3.bf16.msra.mxu0 %v14538_v13  ;;  %v4863_v15 = vsub.f32 %v4743_v25, %v14738_v29  ;;  %v7073_v25 = vsub.f32 %v6974_v54, %v14815_v58 }
 0x115   : > { %13431 = vmatprep.subr.bf16.mxu0 %v14582_v53  ;;  %v4826_v36 = vand.u32 4294901760, %v4825_v5  ;;  %v7065_v5 = vsub.f32 %v7063_v0, %v7064_v24 }
 0x116   : > { %v4864_v38 = vand.u32 4294901760, %v4863_v15 }
 0x117   : > { %12491 = vmatmul.mubr.f32.gmra.mrb[8].mxu0 %v14650_v23  ;;  %v4836_v23 = vand.u32 4294901760, %v4835_v35  ;;  %v7066_v35 = vand.u32 4294901760, %v7065_v5 }
 0x118   : > { %12493 = vmatprep.mubr.f32.mxu0 %v14655_v27  ;;  %v4846_v27 = vand.u32 4294901760, %v4845_v37  ;;  %v4865_v42 = vsub.f32 %v4863_v15, %v4864_v38 }
 0x11a   : > { %v4866_v22 = vand.u32 4294901760, %v4865_v42 }
 0x11b   : > { %12494 = vmatmul.mubr.f32.gmra.mrb[10].mxu0 %v14661_v31  ;;  %v4856_v31 = vand.u32 4294901760, %v4855_v39 }
 0x11c   : > { %12626 = vmatprep.mubr.f32.mxu0 %v4816_v34 }
 0x11f   : > { %12627 = vmatmul.mubr.f32.vlgmr.msra.gmra.mrb[12].mxu0 %v4826_v36 }
 0x120   : > { %12629 = vmatprep.mubr.f32.mxu0 %v4836_v23  ;;  %13433 = vmatpush3.bf16.msra.mxu0 %v14582_v53 }
 0x121   : > { %13435 = vmatprep.subr.bf16.mxu0 %v14584_v55 }
 0x123   : > { %12630 = vmatmul.mubr.f32.gmra.mrb[14].mxu0 %v4846_v27 }
 0x124   : > { %12632 = vmatprep.mubr.f32.mxu0 %v4856_v31 }
 0x127   : > { %12633 = vmatmul.mubr.f32.gmra.mrb[16].mxu0 %v4866_v22 }
 0x128   : > { %12639 = vmatprep.mubr.f32.mxu0 %v14698_v50 }
 0x12b   : > { %12640 = vmatmul.mubr.f32.vlgmr.msra.gmra.mrb[12].mxu0 %v14706_v56 }
 0x12c   : > { %12642 = vmatprep.mubr.f32.mxu0 %v14713_v57  ;;  %13437 = vmatpush3.bf16.msra.mxu0 %v14584_v55 }
 0x12d   : > { %13439 = vmatprep.subr.bf16.mxu0 %v14538_v13 }
 0x12f   : > { %12643 = vmatmul.mubr.f32.gmra.mrb[14].mxu0 %v14723_v9 }
 0x130   : > { %12645 = vmatprep.mubr.f32.mxu0 %v14730_v21 }
 0x133   : > { %12646 = vmatmul.mubr.f32.gmra.mrb[16].mxu0 %v14738_v29 }
 0x134   : > { %12652 = vmatprep.mubr.f32.mxu0 %v14711_v10  ;;  %v14813_v10 = vsub.f32 %v6968_v48, %v14800_v51 }
 0x137   : > { %12653 = vmatmul.mubr.f32.vlgmr.msra.gmra.mrb[12].mxu0 %v14721_v1  ;;  %v14824_v1 = vand.u32 4294901760, %v6977_v61 }
 0x138   : > { %12655 = vmatprep.mubr.f32.mxu0 %v14728_v17  ;;  %13441 = vmatpush3.bf16.msra.mxu0 %v14538_v13  ;;  %v7054_v17 = vand.u32 4294901760, %v14813_v10 }
 0x139   : > { %13443 = vmatprep.subr.bf16.mxu0 %v14598_v59 }
 0x13b   : > { %12656 = vmatmul.mubr.f32.gmra.mrb[14].mxu0 %v14736_v28  ;;  %v7083_v28 = vsub.f32 %v6977_v61, %v14824_v1 }
 0x13c   : > { %12658 = vmatprep.mubr.f32.mxu0 %v4853_v8 }
 0x13f   : > { %12659 = vmatmul.mubr.f32.gmra.mrb[16].mxu0 %v4863_v15 }
 0x140   : > { %12665 = vmatprep.mubr.f32.mxu0 %v4814_v16  ;;  %v6980_v16 = vsel %vm300_vm0, %v6965_v11, 0 }
 0x143   : > { %12666 = vmatmul.mubr.f32.vlgmr.msra.gmra.mrb[12].mxu0 %v4824_v26  ;;  %v14830_v26 = vand.u32 4294901760, %v6980_v16 }
 0x144   : > { %12668 = vmatprep.mubr.f32.mxu0 %v4834_v30  ;;  %13445 = vmatpush3.bf16.msra.mxu0 %v14598_v59  ;;  %v7074_v30 = vand.u32 4294901760, %v7073_v25 }
 0x145   : > { %13447 = vmatprep.subr.bf16.mxu0 %v14538_v13  ;;  %v7093_v8 = vsub.f32 %v6980_v16, %v14830_v26 }
 0x146   : > { %v7075_v34 = vsub.f32 %v7073_v25, %v7074_v30 }
 0x147   : > { %12669 = vmatmul.mubr.f32.gmra.mrb[14].mxu0 %v4844_v33  ;;  %v7103_v33 = vsub.f32 %v6983_v18, %v14835_v63 }
 0x148   : > { %12671 = vmatprep.mubr.f32.mxu0 %v4854_v14  ;;  %v7076_v37 = vand.u32 4294901760, %v7075_v34 }
 0x149   : > { %v7104_v36 = vand.u32 4294901760, %v7103_v33 }
 0x14b   : > { %12672 = vmatmul.mubr.f32.gmra.mrb[16].mxu0 %v4864_v38 }
 0x14c   : > { %12678 = vmatprep.mubr.f32.mxu0 %v14698_v50 }
 0x14f   : > { %12679 = vmatmul.mubr.f32.vlgmr.msra.gmra.mrb[12].mxu0 %v14706_v56 }
 0x150   : > { %12681 = vmatprep.mubr.f32.mxu0 %v14713_v57  ;;  %13449 = vmatpush3.bf16.msra.mxu0 %v14538_v13 }
 0x151   : > { %13523 = vmatprep.subr.bf16.mxu0 %v14538_v13 }
 0x153   : > { %12682 = vmatmul.mubr.f32.gmra.mrb[14].mxu0 %v14723_v9 }
 0x154   : > { %12684 = vmatprep.mubr.f32.mxu0 %v14730_v21 }
 0x157   : > { %12685 = vmatmul.mubr.f32.gmra.mrb[16].mxu0 %v14738_v29 }
 0x158   : > { %12691 = vmatprep.mubr.f32.mxu0 %v14698_v50  ;;  %v7055_v50 = vsub.f32 %v14813_v10, %v7054_v17 }
 0x15a   : > { %v7056_v15 = vand.u32 4294901760, %v7055_v50 }
 0x15b   : > { %12692 = vmatmul.mubr.f32.vlgmr.msra.gmra.mrb[12].mxu0 %v14706_v56  ;;  %v7084_v56 = vand.u32 4294901760, %v7083_v28 }
 0x15c   : > { %12694 = vmatprep.mubr.f32.mxu0 %v14713_v57  ;;  %13525 = vmatpush3.bf16.msra.mxu0 %v14538_v13  ;;  %v7094_v57 = vand.u32 4294901760, %v7093_v8 }
 0x15d   : > { %13527 = vmatprep.subr.bf16.mxu0 %v14582_v53  ;;  %v7085_v14 = vsub.f32 %v7083_v28, %v7084_v56 }
 0x15e   : > { %v7095_v38 = vsub.f32 %v7093_v8, %v7094_v57 }
 0x15f   : > { %12695 = vmatmul.mubr.f32.gmra.mrb[14].mxu0 %v14723_v9  ;;  %v7086_v20 = vand.u32 4294901760, %v7085_v14  ;;  %v7105_v9 = vsub.f32 %v7103_v33, %v7104_v36 }
 0x160   : > { %12697 = vmatprep.mubr.f32.mxu0 %v14730_v21  ;;  %v7096_v23 = vand.u32 4294901760, %v7095_v38 }
 0x161   : > { %v7106_v21 = vand.u32 4294901760, %v7105_v9 }
 0x163   : > { %12698 = vmatmul.mubr.f32.gmra.mrb[16].mxu0 %v14738_v29  ;;  %v299_v29 = vld [vmem:[#allocation2 + $0x8] sm:$0xff] }
 0x164   : > { %12830 = vmatprep.mubr.f32.mxu0 %v7056_v15  ;;  %v997_v39 = vsel %vm300_vm0, %v299_v29, 0 }
 0x165   : > { %v14862_v40 = vand.u32 4294901760, %v997_v39 }
 0x167   : > { %12831 = vmatmul.mubr.f32.vlgmr.msra.gmra.mrb[18].mxu0 %v7066_v35  ;;  %v14867_v27 = vsub.f32 %v997_v39, %v14862_v40 }
 0x168   : > { %12833 = vmatprep.mubr.f32.mxu0 %v7076_v37  ;;  %13529 = vmatpush3.bf16.msra.mxu0 %v14582_v53 }
 0x169   : > { %13531 = vmatprep.subr.bf16.mxu0 %v14584_v55  ;;  %v14874_v42 = vand.u32 4294901760, %v14867_v27 }
 0x16b   : > { %12834 = vmatmul.mubr.f32.gmra.mrb[20].mxu0 %v7086_v20  ;;  %v1079_v47 = vsub.f32 %v14867_v27, %v14874_v42 }
 0x16c   : > { %12836 = vmatprep.mubr.f32.mxu0 %v7096_v23 }
 0x16f   : > { %12837 = vmatmul.mubr.f32.gmra.mrb[22].mxu0 %v7106_v21 }
 0x170   : > { %12843 = vmatprep.mubr.f32.mxu0 %v14800_v51 }
 0x173   : > { %12844 = vmatmul.mubr.f32.vlgmr.msra.gmra.mrb[18].mxu0 %v14807_v52 }
 0x174   : > { %12846 = vmatprep.mubr.f32.mxu0 %v14815_v58  ;;  %13533 = vmatpush3.bf16.msra.mxu0 %v14584_v55 }
 0x175   : > { %13535 = vmatprep.subr.bf16.mxu0 %v14538_v13 }
 0x177   : > { %12847 = vmatmul.mubr.f32.gmra.mrb[20].mxu0 %v14824_v1 }
 0x178   : > { %12849 = vmatprep.mubr.f32.mxu0 %v14830_v26 }
 0x17b   : > { %12850 = vmatmul.mubr.f32.gmra.mrb[22].mxu0 %v14835_v63 }
 0x17c   : > { %12856 = vmatprep.mubr.f32.mxu0 %v14813_v10 }
 0x17f   : > { %12857 = vmatmul.mubr.f32.vlgmr.msra.gmra.mrb[18].mxu0 %v7063_v0  ;;  %v14885_v0 = vand.u32 4294901760, %v1079_v47  ;;  %v9171_v47 = vmul.f32 %v14608_v60, %v14608_v60 }
 0x180   : > { %12859 = vmatprep.mubr.f32.mxu0 %v7073_v25  ;;  %13537 = vmatpush3.bf16.msra.mxu0 %v14538_v13 }
 0x181   : > { %13539 = vmatprep.subr.bf16.mxu0 %v14598_v59 }
 0x183   : > { %12860 = vmatmul.mubr.f32.gmra.mrb[20].mxu0 %v7083_v28 }
 0x184   : > { %12862 = vmatprep.mubr.f32.mxu0 %v7093_v8 }
 0x187   : > { %12863 = vmatmul.mubr.f32.gmra.mrb[22].mxu0 %v7103_v33 }
 0x188   : > { %12869 = vmatprep.mubr.f32.mxu0 %v7054_v17 }
 0x18b   : > { %12870 = vmatmul.mubr.f32.vlgmr.msra.gmra.mrb[18].mxu0 %v7064_v24 }
 0x18c   : > { %12872 = vmatprep.mubr.f32.mxu0 %v7074_v30  ;;  %13541 = vmatpush3.bf16.msra.mxu0 %v14598_v59 }
 0x18d   : > { %13543 = vmatprep.subr.bf16.mxu0 %v14538_v13 }
 0x18f   : > { %12873 = vmatmul.mubr.f32.gmra.mrb[20].mxu0 %v7084_v56 }
 0x190   : > { %12875 = vmatprep.mubr.f32.mxu0 %v7094_v57 }
 0x193   : > { %12876 = vmatmul.mubr.f32.gmra.mrb[22].mxu0 %v7104_v36 }
 0x194   : > { %12882 = vmatprep.mubr.f32.mxu0 %v14800_v51 }
 0x197   : > { %12883 = vmatmul.mubr.f32.vlgmr.msra.gmra.mrb[18].mxu0 %v14807_v52 }
 0x198   : > { %12885 = vmatprep.mubr.f32.mxu0 %v14815_v58  ;;  %13545 = vmatpush3.bf16.msra.mxu0 %v14538_v13 }
 0x199   : > { %13619 = vmatprep.subr.bf16.mxu0 %v14538_v13 }
 0x19b   : > { %12886 = vmatmul.mubr.f32.gmra.mrb[20].mxu0 %v14824_v1 }
 0x19c   : > { %12888 = vmatprep.mubr.f32.mxu0 %v14830_v26 }
 0x19e   : > { %v12285_v31 = vpop.f32.mrb[0].mxu0 }
 0x19f   : > { %v1003_v22 = vand.u32 4294901760, %v12285_v31  ;;  %v959_v46 = vpop.f32.mrb[1].mxu0  ;;  %12889 = vmatmul.mubr.f32.gmra.mrb[22].mxu0 %v14835_v63 }
 0x1a0   : > { %v1000_v44 = vand.u32 4294901760, %v959_v46  ;;  %12895 = vmatprep.mubr.f32.mxu0 %v14800_v51 }
 0x1a1   : > { %v1095_v48 = vsub.f32 %v12285_v31, %v1003_v22 }
 0x1a2   : > { %v14881_v49 = vpack.c.bf16 %v1003_v22, %v1000_v44  ;;  %v1088_v2 = vsub.f32 %v959_v46, %v1000_v44  ;;  %v12288_v6 = vpop.f32.mrb[2].mxu0  ;;  %v9172_v44 = vmul.f32 %v14522_v7, %v14522_v7 }
 0x1a3   : > { %v1096_v54 = vand.u32 4294901760, %v1095_v48  ;;  %v1505_v10 = vand.u32 4294901760, %v12288_v6  ;;  %v971_v61 = vpop.f32.mrb[3].mxu0  ;;  %12896 = vmatmul.mubr.f32.vlgmr.msra.gmra.mrb[18].mxu0 %v14807_v52 }
 0x1a4   : > { %v1089_v11 = vand.u32 4294901760, %v1088_v2  ;;  %v1502_v12 = vand.u32 4294901760, %v971_v61  ;;  %13259 = vmatprep.subr.bf16.mxu1 %v14881_v49  ;;  %v13266_v16 = vpack.c.bf16 %v1095_v48, %v1088_v2  ;;  %12898 = vmatprep.mubr.f32.mxu0 %v14815_v58 }
 0x1a5   : > { %v1097_v51 = vsub.f32 %v1095_v48, %v1096_v54  ;;  %v1597_v17 = vsub.f32 %v12288_v6, %v1505_v10  ;;  %13261 = vmatpush3.bf16.msra.mxu1 %v14881_v49  ;;  %13621 = vmatpush3.bf16.msra.mxu0 %v14538_v13  ;;  %v9178_v48 = vsel %vm300_vm0, %v9171_v47, 0  ;;  %v9173_v6 = vmul.f32 %v14614_v62, %v14614_v62 }
 0x1a6   : > { %v1090_v25 = vsub.f32 %v1088_v2, %v1089_v11  ;;  %v14890_v18 = vpack.c.bf16 %v1505_v10, %v1502_v12  ;;  %v1590_v24 = vsub.f32 %v971_v61, %v1502_v12  ;;  %v12291_v52 = vpop.f32.mrb[4].mxu0  ;;  %v13274_v28 = vpack.c.bf16 %v1096_v54, %v1089_v11  ;;  %13623 = vmatprep.subr.bf16.mxu0 %v14582_v53 }
 0x1a7   : > { %v1598_v50 = vand.u32 4294901760, %v1597_v17  ;;  %v2007_v30 = vand.u32 4294901760, %v12291_v52  ;;  %v983_v8 = vpop.f32.mrb[5].mxu0  ;;  %v1098_v5 = vand.u32 4294901760, %v1097_v51  ;;  %12899 = vmatmul.mubr.f32.gmra.mrb[20].mxu0 %v14824_v1  ;;  %v9181_v2 = vsel %vm300_vm0, %v9172_v44, 0 }
 0x1a8   : > { %v1591_v58 = vand.u32 4294901760, %v1590_v24  ;;  %v2004_v56 = vand.u32 4294901760, %v983_v8  ;;  %12297 = vmatmul.mubr.f32.vlgmr.msra.gmra.mrb[0].mxu1 %v14885_v0  ;;  %v1091_v33 = vand.u32 4294901760, %v1090_v25  ;;  %v14895_v15 = vpack.c.bf16 %v1597_v17, %v1590_v24  ;;  %12901 = vmatprep.mubr.f32.mxu0 %v14830_v26 }
 0x1a9   : > { %v1599_v34 = vsub.f32 %v1597_v17, %v1598_v50  ;;  %v2099_v57 = vsub.f32 %v12291_v52, %v2007_v30  ;;  %12303 = vmatprep.mubr.f32.mxu1 %v14757_v41  ;;  %v14936_v7 = vand.u32 4294901760, %v9181_v2  ;;  %v9174_v54 = vmul.f32 %v14627_v3, %v14627_v3 }
 0x1aa   : > { %v1592_v35 = vsub.f32 %v1590_v24, %v1591_v58  ;;  %v14899_v14 = vpack.c.bf16 %v2007_v30, %v2004_v56  ;;  %v2092_v36 = vsub.f32 %v983_v8, %v2004_v56  ;;  %v13262_v37 = vpack.c.bf16 %v1098_v5, %v1091_v33 }
 0x1ab   : > { %v2100_v38 = vand.u32 4294901760, %v2099_v57  ;;  %v1600_v1 = vand.u32 4294901760, %v1599_v34  ;;  %v14901_v20 = vpack.c.bf16 %v1598_v50, %v1591_v58  ;;  %12902 = vmatmul.mubr.f32.gmra.mrb[22].mxu0 %v14835_v63  ;;  %v14947_v10 = vsub.f32 %v9181_v2, %v14936_v7 }
 0x1ac   : > { %v2093_v9 = vand.u32 4294901760, %v2092_v36  ;;  %13263 = vmatprep.subr.bf16.mxu1 %v13262_v37  ;;  %v1593_v23 = vand.u32 4294901760, %v1592_v35  ;;  %v14904_v21 = vpack.c.bf16 %v2099_v57, %v2092_v36  ;;  %v9184_v61 = vsel %vm300_vm0, %v9173_v6, 0 }
 0x1ad   : > { %v2101_v26 = vsub.f32 %v2099_v57, %v2100_v38  ;;  %13265 = vmatpush3.bf16.msra.mxu1 %v13262_v37  ;;  %v14951_v12 = vand.u32 4294901760, %v9184_v61  ;;  %v9274_v62 = vand.u32 4294901760, %v14947_v10  ;;  %v9175_v17 = vmul.f32 %v14630_v4, %v14630_v4 }
 0x1ae   : > { %v2094_v29 = vsub.f32 %v2092_v36, %v2093_v9  ;;  %13267 = vmatprep.subr.bf16.mxu1 %v13266_v16  ;;  %v13286_v39 = vpack.c.bf16 %v1600_v1, %v1593_v23  ;;  %v14906_v31 = vpack.c.bf16 %v2100_v38, %v2093_v9  ;;  %v9176_v24 = vmul.f32 %v14646_v19, %v14646_v19 }
 0x1af   : > { %v2102_v22 = vand.u32 4294901760, %v2101_v26  ;;  %v14963_v25 = vsub.f32 %v9184_v61, %v14951_v12  ;;  %v9275_v52 = vsub.f32 %v14947_v10, %v9274_v62  ;;  %v9190_v50 = vsel %vm300_vm0, %v9175_v17, 0 }
 0x1b0   : > { %12304 = vmatmul.mubr.f32.vlgmr.msra.gmra.mrb[0].mxu1 %v14862_v40  ;;  %v2095_v46 = vand.u32 4294901760, %v2094_v29  ;;  %v14976_v8 = vand.u32 4294901760, %v9190_v50  ;;  %v9193_v5 = vsel %vm300_vm0, %v9176_v24, 0 }
 0x1b1   : > { %13269 = vmatpush3.bf16.msra.mxu1 %v13266_v16  ;;  %12310 = vmatprep.mubr.f32.mxu1 %v14760_v43  ;;  %v9187_v16 = vsel %vm300_vm0, %v9174_v54, 0  ;;  %v9284_v30 = vand.u32 4294901760, %v14963_v25  ;;  %v9276_v19 = vand.u32 4294901760, %v9275_v52  ;;  %v14982_v56 = vand.u32 4294901760, %v9193_v5 }
 0x1b2   : > { %13271 = vmatprep.subr.bf16.mxu1 %v14881_v49  ;;  %v14911_v63 = vpack.c.bf16 %v2102_v22, %v2095_v46  ;;  %v14955_v51 = vand.u32 4294901760, %v9187_v16  ;;  %v14989_v34 = vsub.f32 %v9190_v50, %v14976_v8 }
 0x1b3   : > { %v9285_v33 = vsub.f32 %v14963_v25, %v9284_v30  ;;  %v14995_v57 = vsub.f32 %v9193_v5, %v14982_v56 }
 0x1b4   : > { %v9304_v36 = vand.u32 4294901760, %v14989_v34 }
 0x1b5   : > { %v9286_v35 = vand.u32 4294901760, %v9285_v33  ;;  %v9314_v38 = vand.u32 4294901760, %v14995_v57 }
 0x1b6   : > { %v9305_v1 = vsub.f32 %v14989_v34, %v9304_v36 }
 0x1b7   : > { %v9315_v9 = vsub.f32 %v14995_v57, %v9314_v38 }
 0x1b8   : > { %12311 = vmatmul.mubr.f32.vlgmr.msra.gmra.mrb[0].mxu1 %v14867_v27  ;;  %v9306_v23 = vand.u32 4294901760, %v9305_v1 }
 0x1b9   : > { %13273 = vmatpush3.bf16.msra.mxu1 %v14881_v49  ;;  %12317 = vmatprep.mubr.f32.mxu1 %v14765_v45 }
 0x1ba   : > { %13275 = vmatprep.subr.bf16.mxu1 %v13274_v28 }
 0x1c0   : > { %12318 = vmatmul.mubr.f32.vlgmr.msra.gmra.mrb[0].mxu1 %v14874_v42 }
 0x1c1   : > { %13277 = vmatpush3.bf16.msra.mxu1 %v13274_v28  ;;  %12324 = vmatprep.mubr.f32.mxu1 %v14757_v41  ;;  %v14971_v28 = vsub.f32 %v9187_v16, %v14955_v51 }
 0x1c2   : > { %13279 = vmatprep.subr.bf16.mxu1 %v14881_v49 }
 0x1c3   : > { %v9294_v58 = vand.u32 4294901760, %v14971_v28 }
 0x1c8   : > { %12325 = vmatmul.mubr.f32.vlgmr.msra.gmra.mrb[0].mxu1 %v14862_v40 }
 0x1c9   : > { %13281 = vmatpush3.bf16.msra.mxu1 %v14881_v49  ;;  %12331 = vmatprep.mubr.f32.mxu1 %v14757_v41  ;;  %v14932_v49 = vand.u32 4294901760, %v9178_v48 }
 0x1ca   : > { %13283 = vmatprep.subr.bf16.mxu1 %v14890_v18 }
 0x1cb   : > { %v14942_v60 = vsub.f32 %v9178_v48, %v14932_v49 }
 0x1cd   : > { %v9264_v11 = vand.u32 4294901760, %v14942_v60 }
 0x1cf   : > { %v9265_v3 = vsub.f32 %v14942_v60, %v9264_v11 }
 0x1d0   : > { %12332 = vmatmul.mubr.f32.vlgmr.msra.gmra.mrb[0].mxu1 %v14862_v40 }
 0x1d1   : > { %13285 = vmatpush3.bf16.msra.mxu1 %v14890_v18  ;;  %12338 = vmatprep.mubr.f32.mxu1 %v14769_v32  ;;  %v9266_v4 = vand.u32 4294901760, %v9265_v3 }
 0x1d2   : > { %13287 = vmatprep.subr.bf16.mxu1 %v13286_v39 }
 0x1d3   : > { %13034 = vmatprep.mubr.f32.mxu0 %v9266_v4 }
 0x1d4   : > { %12339 = vmatmul.mubr.f32.vlgmr.msra.gmra.mrb[2].mxu1 %v14885_v0  ;;  %13035 = vmatmul.mubr.f32.vlgmr.msra.gmra.mrb[24].mxu0 %v9276_v19 }
 0x1d5   : > { %13289 = vmatpush3.bf16.msra.mxu1 %v13286_v39  ;;  %12345 = vmatprep.mubr.f32.mxu1 %v14757_v41 }
 0x1d6   : > { %13291 = vmatprep.subr.bf16.mxu1 %v14895_v15  ;;  %13625 = vmatpush3.bf16.msra.mxu0 %v14582_v53  ;;  %v9316_v53 = vand.u32 4294901760, %v9315_v9 }
 0x1d7   : > { %13627 = vmatprep.subr.bf16.mxu0 %v14584_v55  ;;  %13037 = vmatprep.mubr.f32.mxu0 %v9286_v35 }
 0x1dc   : > { %12346 = vmatmul.mubr.f32.vlgmr.msra.gmra.mrb[2].mxu1 %v14862_v40 }
 0x1dd   : > { %13293 = vmatpush3.bf16.msra.mxu1 %v14895_v15  ;;  %12352 = vmatprep.mubr.f32.mxu1 %v14760_v43  ;;  %v9295_v15 = vsub.f32 %v14971_v28, %v9294_v58 }
 0x1de   : > { %13295 = vmatprep.subr.bf16.mxu1 %v14890_v18 }
 0x1df   : > { %v9296_v37 = vand.u32 4294901760, %v9295_v15 }
 0x1e1   : > { %13038 = vmatmul.mubr.f32.gmra.mrb[26].mxu0 %v9296_v37 }
 0x1e2   : > { %13040 = vmatprep.mubr.f32.mxu0 %v9306_v23 }
 0x1e4   : > { %12353 = vmatmul.mubr.f32.vlgmr.msra.gmra.mrb[2].mxu1 %v14867_v27 }
 0x1e5   : > { %13297 = vmatpush3.bf16.msra.mxu1 %v14890_v18  ;;  %12359 = vmatprep.mubr.f32.mxu1 %v14765_v45 }
 0x1e6   : > { %13299 = vmatprep.subr.bf16.mxu1 %v14901_v20  ;;  %v12489_v26 = vpop.f32.mrb[6].mxu0  ;;  %13041 = vmatmul.mubr.f32.gmra.mrb[28].mxu0 %v9316_v53 }
 0x1e7   : > { %v3201_v29 = vand.u32 4294901760, %v12489_v26  ;;  %v3163_v39 = vpop.f32.mrb[7].mxu0  ;;  %13047 = vmatprep.mubr.f32.mxu0 %v14932_v49 }
 0x1e8   : > { %v3198_v22 = vand.u32 4294901760, %v3163_v39 }
 0x1e9   : > { %v3293_v46 = vsub.f32 %v12489_v26, %v3201_v29 }
 0x1ea   : > { %v15012_v44 = vpack.c.bf16 %v3201_v29, %v3198_v22  ;;  %v3286_v47 = vsub.f32 %v3163_v39, %v3198_v22  ;;  %v12492_v48 = vpop.f32.mrb[8].mxu0  ;;  %13048 = vmatmul.mubr.f32.vlgmr.msra.gmra.mrb[24].mxu0 %v14936_v7 }
 0x1eb   : > { %v3294_v2 = vand.u32 4294901760, %v3293_v46  ;;  %v3703_v6 = vand.u32 4294901760, %v12492_v48  ;;  %v3175_v54 = vpop.f32.mrb[9].mxu0  ;;  %13050 = vmatprep.mubr.f32.mxu0 %v14951_v12  ;;  %13629 = vmatpush3.bf16.msra.mxu0 %v14584_v55 }
 0x1ec   : > { %v3287_v61 = vand.u32 4294901760, %v3286_v47  ;;  %v3700_v16 = vand.u32 4294901760, %v3175_v54  ;;  %12360 = vmatmul.mubr.f32.vlgmr.msra.gmra.mrb[2].mxu1 %v14874_v42  ;;  %v15016_v17 = vpack.c.bf16 %v3293_v46, %v3286_v47  ;;  %13631 = vmatprep.subr.bf16.mxu0 %v14538_v13 }
 0x1ed   : > { %v3295_v3 = vsub.f32 %v3293_v46, %v3294_v2  ;;  %v3795_v24 = vsub.f32 %v12492_v48, %v3703_v6  ;;  %13301 = vmatpush3.bf16.msra.mxu1 %v14901_v20  ;;  %12366 = vmatprep.mubr.f32.mxu1 %v14757_v41 }
 0x1ee   : > { %v3288_v52 = vsub.f32 %v3286_v47, %v3287_v61  ;;  %v15021_v50 = vpack.c.bf16 %v3703_v6, %v3700_v16  ;;  %v3788_v4 = vsub.f32 %v3175_v54, %v3700_v16  ;;  %13303 = vmatprep.subr.bf16.mxu1 %v14890_v18  ;;  %v12495_v5 = vpop.f32.mrb[10].mxu0  ;;  %v15024_v19 = vpack.c.bf16 %v3294_v2, %v3287_v61 }
 0x1ef   : > { %v3796_v33 = vand.u32 4294901760, %v3795_v24  ;;  %v4205_v15 = vand.u32 4294901760, %v12495_v5  ;;  %v3187_v35 = vpop.f32.mrb[11].mxu0  ;;  %v3296_v37 = vand.u32 4294901760, %v3295_v3  ;;  %13051 = vmatmul.mubr.f32.gmra.mrb[26].mxu0 %v14955_v51 }
 0x1f0   : > { %v3789_v1 = vand.u32 4294901760, %v3788_v4  ;;  %v4202_v9 = vand.u32 4294901760, %v3187_v35  ;;  %v3289_v20 = vand.u32 4294901760, %v3288_v52  ;;  %v15027_v23 = vpack.c.bf16 %v3795_v24, %v3788_v4  ;;  %13053 = vmatprep.mubr.f32.mxu0 %v14976_v8 }
 0x1f1   : > { %v3797_v53 = vsub.f32 %v3795_v24, %v3796_v33  ;;  %v4297_v26 = vsub.f32 %v12495_v5, %v4205_v15 }
 0x1f2   : > { %v3790_v29 = vsub.f32 %v3788_v4, %v3789_v1  ;;  %v15032_v39 = vpack.c.bf16 %v4205_v15, %v4202_v9  ;;  %v4290_v22 = vsub.f32 %v3187_v35, %v4202_v9  ;;  %v15034_v46 = vpack.c.bf16 %v3296_v37, %v3289_v20 }
 0x1f3   : > { %v4298_v47 = vand.u32 4294901760, %v4297_v26  ;;  %v3798_v48 = vand.u32 4294901760, %v3797_v53  ;;  %v15036_v2 = vpack.c.bf16 %v3796_v33, %v3789_v1  ;;  %13054 = vmatmul.mubr.f32.gmra.mrb[28].mxu0 %v14982_v56 }
 0x1f4   : > { %v4291_v6 = vand.u32 4294901760, %v4290_v22  ;;  %12367 = vmatmul.mubr.f32.vlgmr.msra.gmra.mrb[2].mxu1 %v14862_v40  ;;  %v3791_v55 = vand.u32 4294901760, %v3790_v29  ;;  %13060 = vmatprep.mubr.f32.mxu0 %v14942_v60  ;;  %v15041_v54 = vpack.c.bf16 %v4297_v26, %v4290_v22 }
 0x1f5   : > { %v4299_v61 = vsub.f32 %v4297_v26, %v4298_v47  ;;  %13305 = vmatpush3.bf16.msra.mxu1 %v14890_v18  ;;  %12373 = vmatprep.mubr.f32.mxu1 %v14757_v41 }
 0x1f6   : > { %v4292_v16 = vsub.f32 %v4290_v22, %v4291_v6  ;;  %13307 = vmatprep.subr.bf16.mxu1 %v14899_v14  ;;  %v15046_v3 = vpack.c.bf16 %v3798_v48, %v3791_v55  ;;  %v15048_v24 = vpack.c.bf16 %v4298_v47, %v4291_v6 }
 0x1f7   : > { %13061 = vmatmul.mubr.f32.vlgmr.msra.gmra.mrb[24].mxu0 %v14947_v10  ;;  %v4300_v52 = vand.u32 4294901760, %v4299_v61 }
 0x1f8   : > { %13063 = vmatprep.mubr.f32.mxu0 %v14963_v25  ;;  %13633 = vmatpush3.bf16.msra.mxu0 %v14538_v13  ;;  %v4293_v4 = vand.u32 4294901760, %v4292_v16 }
 0x1f9   : > { %13635 = vmatprep.subr.bf16.mxu0 %v14598_v59 }
 0x1fa   : > { %v15054_v18 = vpack.c.bf16 %v4300_v52, %v4293_v4 }
 0x1fb   : > { %13064 = vmatmul.mubr.f32.gmra.mrb[26].mxu0 %v14971_v28 }
 0x1fc   : > { %12374 = vmatmul.mubr.f32.vlgmr.msra.gmra.mrb[2].mxu1 %v14862_v40  ;;  %13066 = vmatprep.mubr.f32.mxu0 %v14989_v34 }
 0x1fd   : > { %13309 = vmatpush3.bf16.msra.mxu1 %v14899_v14  ;;  %12380 = vmatprep.mubr.f32.mxu1 %v14769_v32 }
 0x1fe   : > { %13311 = vmatprep.subr.bf16.mxu1 %v14911_v63 }
 0x1ff   : > { %13067 = vmatmul.mubr.f32.gmra.mrb[28].mxu0 %v14995_v57 }
 0x200   : > { %12381 = vmatmul.mubr.f32.vlgmr.msra.gmra.mrb[4].mxu1 %v14885_v0  ;;  %13073 = vmatprep.mubr.f32.mxu0 %v9264_v11 }
 0x201   : > { %13313 = vmatpush3.bf16.msra.mxu1 %v14911_v63  ;;  %12387 = vmatprep.mubr.f32.mxu1 %v14757_v41 }
 0x202   : > { %13315 = vmatprep.subr.bf16.mxu1 %v14904_v21 }
 0x203   : > { %13074 = vmatmul.mubr.f32.vlgmr.msra.gmra.mrb[24].mxu0 %v9274_v62 }
 0x204   : > { %13076 = vmatprep.mubr.f32.mxu0 %v9284_v30  ;;  %13637 = vmatpush3.bf16.msra.mxu0 %v14598_v59 }
 0x205   : > { %13639 = vmatprep.subr.bf16.mxu0 %v14538_v13 }
 0x207   : > { %13077 = vmatmul.mubr.f32.gmra.mrb[26].mxu0 %v9294_v58 }
 0x208   : > { %12388 = vmatmul.mubr.f32.vlgmr.msra.gmra.mrb[4].mxu1 %v14862_v40  ;;  %13079 = vmatprep.mubr.f32.mxu0 %v9304_v36 }
 0x209   : > { %13317 = vmatpush3.bf16.msra.mxu1 %v14904_v21  ;;  %12394 = vmatprep.mubr.f32.mxu1 %v14760_v43 }
 0x20a   : > { %13319 = vmatprep.subr.bf16.mxu1 %v14899_v14 }
 0x20b   : > { %13080 = vmatmul.mubr.f32.gmra.mrb[28].mxu0 %v9314_v38 }
 0x20c   : > { %13086 = vmatprep.mubr.f32.mxu0 %v14932_v49 }
 0x20f   : > { %13087 = vmatmul.mubr.f32.vlgmr.msra.gmra.mrb[24].mxu0 %v14936_v7 }
 0x210   : > { %12395 = vmatmul.mubr.f32.vlgmr.msra.gmra.mrb[4].mxu1 %v14867_v27  ;;  %13089 = vmatprep.mubr.f32.mxu0 %v14951_v12 }
 0x211   : > { %13321 = vmatpush3.bf16.msra.mxu1 %v14899_v14  ;;  %12401 = vmatprep.mubr.f32.mxu1 %v14765_v45 }
 0x212   : > { %13323 = vmatprep.subr.bf16.mxu1 %v14906_v31  ;;  %13641 = vmatpush3.bf16.msra.mxu0 %v14538_v13 }
 0x213   : > { %13090 = vmatmul.mubr.f32.gmra.mrb[26].mxu0 %v14955_v51 }
 0x214   : > { %13092 = vmatprep.mubr.f32.mxu0 %v14976_v8 }
 0x217   : > { %13093 = vmatmul.mubr.f32.gmra.mrb[28].mxu0 %v14982_v56 }
 0x218   : > { %12402 = vmatmul.mubr.f32.vlgmr.msra.gmra.mrb[4].mxu1 %v14874_v42  ;;  %13099 = vmatprep.mubr.f32.mxu0 %v14932_v49 }
 0x219   : > { %13325 = vmatpush3.bf16.msra.mxu1 %v14906_v31  ;;  %12408 = vmatprep.mubr.f32.mxu1 %v14757_v41 }
 0x21a   : > { %13327 = vmatprep.subr.bf16.mxu1 %v14899_v14 }
 0x21b   : > { %13100 = vmatmul.mubr.f32.vlgmr.msra.gmra.mrb[24].mxu0 %v14936_v7 }
 0x21c   : > { %13102 = vmatprep.mubr.f32.mxu0 %v14951_v12 }
 0x21f   : > { %13103 = vmatmul.mubr.f32.gmra.mrb[26].mxu0 %v14955_v51 }
 0x220   : > { %12409 = vmatmul.mubr.f32.vlgmr.msra.gmra.mrb[4].mxu1 %v14862_v40  ;;  %13105 = vmatprep.mubr.f32.mxu0 %v14976_v8 }
 0x221   : > { %13329 = vmatpush3.bf16.msra.mxu1 %v14899_v14  ;;  %12415 = vmatprep.mubr.f32.mxu1 %v14757_v41 }
 0x222   : > { %13355 = vmatprep.subr.bf16.mxu1 %v15012_v44 }
 0x223   : > { %13106 = vmatmul.mubr.f32.gmra.mrb[28].mxu0 %v14982_v56 }
 0x228   : > { %12416 = vmatmul.mubr.f32.vlgmr.msra.gmra.mrb[4].mxu1 %v14862_v40 }
 0x229   : > { %13357 = vmatpush3.bf16.msra.mxu1 %v15012_v44  ;;  %12500 = vmatprep.mubr.f32.mxu1 %v14769_v32 }
 0x22a   : > { %13359 = vmatprep.subr.bf16.mxu1 %v15034_v46 }
 0x22c   : > { %12501 = vmatmul.mubr.f32.vlgmr.msra.gmra.mrb[6].mxu1 %v14885_v0 }
 0x22d   : > { %13361 = vmatpush3.bf16.msra.mxu1 %v15034_v46  ;;  %12507 = vmatprep.mubr.f32.mxu1 %v14757_v41 }
 0x22e   : > { %13363 = vmatprep.subr.bf16.mxu1 %v15016_v17  ;;  %v12693_v13 = vpop.f32.mrb[12].mxu0 }
 0x22f   : > { %v5423_v59 = vand.u32 4294901760, %v12693_v13  ;;  %v5385_v14 = vpop.f32.mrb[13].mxu0 }
 0x230   : > { %v5420_v21 = vand.u32 4294901760, %v5385_v14 }
 0x231   : > { %v5515_v31 = vsub.f32 %v12693_v13, %v5423_v59 }
 0x232   : > { %v15118_v63 = vpack.c.bf16 %v5423_v59, %v5420_v21  ;;  %v5508_v49 = vsub.f32 %v5385_v14, %v5420_v21  ;;  %v12696_v7 = vpop.f32.mrb[14].mxu0 }
 0x233   : > { %v5516_v60 = vand.u32 4294901760, %v5515_v31  ;;  %v5925_v10 = vand.u32 4294901760, %v12696_v7  ;;  %v5397_v11 = vpop.f32.mrb[15].mxu0 }
 0x234   : > { %12508 = vmatmul.mubr.f32.vlgmr.msra.gmra.mrb[6].mxu1 %v14862_v40  ;;  %v5509_v12 = vand.u32 4294901760, %v5508_v49  ;;  %v5922_v62 = vand.u32 4294901760, %v5397_v11  ;;  %v15121_v51 = vpack.c.bf16 %v5515_v31, %v5508_v49 }
 0x235   : > { %13365 = vmatpush3.bf16.msra.mxu1 %v15016_v17  ;;  %12514 = vmatprep.mubr.f32.mxu1 %v14760_v43  ;;  %v5517_v25 = vsub.f32 %v5515_v31, %v5516_v60  ;;  %v6017_v28 = vsub.f32 %v12696_v7, %v5925_v10 }
 0x236   : > { %13367 = vmatprep.subr.bf16.mxu1 %v15012_v44  ;;  %v5510_v30 = vsub.f32 %v5508_v49, %v5509_v12  ;;  %v15126_v8 = vpack.c.bf16 %v5925_v10, %v5922_v62  ;;  %v6010_v58 = vsub.f32 %v5397_v11, %v5922_v62  ;;  %v12699_v56 = vpop.f32.mrb[16].mxu0  ;;  %v15128_v34 = vpack.c.bf16 %v5516_v60, %v5509_v12 }
 0x237   : > { %v6018_v57 = vand.u32 4294901760, %v6017_v28  ;;  %v6427_v36 = vand.u32 4294901760, %v12699_v56  ;;  %v5409_v38 = vpop.f32.mrb[17].mxu0  ;;  %v5518_v5 = vand.u32 4294901760, %v5517_v25 }
 0x238   : > { %v6011_v33 = vand.u32 4294901760, %v6010_v58  ;;  %v6424_v15 = vand.u32 4294901760, %v5409_v38  ;;  %v5511_v17 = vand.u32 4294901760, %v5510_v30  ;;  %v15130_v35 = vpack.c.bf16 %v6017_v28, %v6010_v58 }
 0x239   : > { %v6019_v37 = vsub.f32 %v6017_v28, %v6018_v57  ;;  %v6519_v1 = vsub.f32 %v12699_v56, %v6427_v36 }
 0x23a   : > { %v6012_v9 = vsub.f32 %v6010_v58, %v6011_v33  ;;  %v15132_v20 = vpack.c.bf16 %v6427_v36, %v6424_v15  ;;  %v6512_v53 = vsub.f32 %v5409_v38, %v6424_v15  ;;  %v15134_v26 = vpack.c.bf16 %v5518_v5, %v5511_v17 }
 0x23b   : > { %v6520_v29 = vand.u32 4294901760, %v6519_v1  ;;  %v6020_v22 = vand.u32 4294901760, %v6019_v37  ;;  %v15136_v46 = vpack.c.bf16 %v6018_v57, %v6011_v33 }
 0x23c   : > { %12515 = vmatmul.mubr.f32.vlgmr.msra.gmra.mrb[6].mxu1 %v14867_v27  ;;  %v6513_v47 = vand.u32 4294901760, %v6512_v53  ;;  %v6013_v48 = vand.u32 4294901760, %v6012_v9  ;;  %v15139_v6 = vpack.c.bf16 %v6519_v1, %v6512_v53 }
 0x23d   : > { %13369 = vmatpush3.bf16.msra.mxu1 %v15012_v44  ;;  %12521 = vmatprep.mubr.f32.mxu1 %v14765_v45  ;;  %v6521_v55 = vsub.f32 %v6519_v1, %v6520_v29 }
 0x23e   : > { %13371 = vmatprep.subr.bf16.mxu1 %v15024_v19  ;;  %v6514_v61 = vsub.f32 %v6512_v53, %v6513_v47  ;;  %v15144_v16 = vpack.c.bf16 %v6020_v22, %v6013_v48  ;;  %v15146_v52 = vpack.c.bf16 %v6520_v29, %v6513_v47 }
 0x23f   : > { %v6522_v4 = vand.u32 4294901760, %v6521_v55 }
 0x240   : > { %v6515_v13 = vand.u32 4294901760, %v6514_v61 }
 0x242   : > { %v15148_v59 = vpack.c.bf16 %v6522_v4, %v6515_v13 }
 0x244   : > { %12522 = vmatmul.mubr.f32.vlgmr.msra.gmra.mrb[6].mxu1 %v14874_v42 }
 0x245   : > { %13373 = vmatpush3.bf16.msra.mxu1 %v15024_v19  ;;  %12528 = vmatprep.mubr.f32.mxu1 %v14757_v41 }
 0x246   : > { %13375 = vmatprep.subr.bf16.mxu1 %v15012_v44 }
 0x24c   : > { %12529 = vmatmul.mubr.f32.vlgmr.msra.gmra.mrb[6].mxu1 %v14862_v40 }
 0x24d   : > { %13377 = vmatpush3.bf16.msra.mxu1 %v15012_v44  ;;  %12535 = vmatprep.mubr.f32.mxu1 %v14757_v41 }
 0x24e   : > { %13379 = vmatprep.subr.bf16.mxu1 %v15021_v50 }
 0x254   : > { %12536 = vmatmul.mubr.f32.vlgmr.msra.gmra.mrb[6].mxu1 %v14862_v40 }
 0x255   : > { %13381 = vmatpush3.bf16.msra.mxu1 %v15021_v50  ;;  %12542 = vmatprep.mubr.f32.mxu1 %v14769_v32 }
 0x256   : > { %13383 = vmatprep.subr.bf16.mxu1 %v15046_v3 }
 0x258   : > { %12543 = vmatmul.mubr.f32.vlgmr.msra.gmra.mrb[8].mxu1 %v14885_v0 }
 0x259   : > { %13385 = vmatpush3.bf16.msra.mxu1 %v15046_v3  ;;  %12549 = vmatprep.mubr.f32.mxu1 %v14757_v41 }
 0x25a   : > { %13387 = vmatprep.subr.bf16.mxu1 %v15027_v23 }
 0x260   : > { %12550 = vmatmul.mubr.f32.vlgmr.msra.gmra.mrb[8].mxu1 %v14862_v40 }
 0x261   : > { %13389 = vmatpush3.bf16.msra.mxu1 %v15027_v23  ;;  %12556 = vmatprep.mubr.f32.mxu1 %v14760_v43 }
 0x262   : > { %13391 = vmatprep.subr.bf16.mxu1 %v15021_v50 }
 0x268   : > { %12557 = vmatmul.mubr.f32.vlgmr.msra.gmra.mrb[8].mxu1 %v14867_v27 }
 0x269   : > { %13393 = vmatpush3.bf16.msra.mxu1 %v15021_v50  ;;  %12563 = vmatprep.mubr.f32.mxu1 %v14765_v45 }
 0x26a   : > { %13395 = vmatprep.subr.bf16.mxu1 %v15036_v2 }
 0x270   : > { %12564 = vmatmul.mubr.f32.vlgmr.msra.gmra.mrb[8].mxu1 %v14874_v42 }
 0x271   : > { %13397 = vmatpush3.bf16.msra.mxu1 %v15036_v2  ;;  %12570 = vmatprep.mubr.f32.mxu1 %v14757_v41 }
 0x272   : > { %13399 = vmatprep.subr.bf16.mxu1 %v15021_v50 }
 0x276   : > { %v12897_v44 = vpop.f32.mrb[18].mxu0 }
 0x277   : > { %v7663_v19 = vand.u32 4294901760, %v12897_v44  ;;  %v7625_v23 = vpop.f32.mrb[19].mxu0 }
 0x278   : > { %12571 = vmatmul.mubr.f32.vlgmr.msra.gmra.mrb[8].mxu1 %v14862_v40  ;;  %v7660_v3 = vand.u32 4294901760, %v7625_v23 }
 0x279   : > { %13401 = vmatpush3.bf16.msra.mxu1 %v15021_v50  ;;  %12577 = vmatprep.mubr.f32.mxu1 %v14757_v41  ;;  %v7755_v14 = vsub.f32 %v12897_v44, %v7663_v19 }
 0x27a   : > { %13403 = vmatprep.subr.bf16.mxu1 %v15032_v39  ;;  %v15182_v21 = vpack.c.bf16 %v7663_v19, %v7660_v3  ;;  %v7748_v2 = vsub.f32 %v7625_v23, %v7660_v3  ;;  %v12900_v31 = vpop.f32.mrb[20].mxu0 }
 0x27b   : > { %v7756_v49 = vand.u32 4294901760, %v7755_v14  ;;  %v8165_v7 = vand.u32 4294901760, %v12900_v31  ;;  %v7637_v60 = vpop.f32.mrb[21].mxu0 }
 0x27c   : > { %v7749_v10 = vand.u32 4294901760, %v7748_v2  ;;  %v8162_v11 = vand.u32 4294901760, %v7637_v60  ;;  %v15184_v12 = vpack.c.bf16 %v7755_v14, %v7748_v2 }
 0x27d   : > { %v7757_v62 = vsub.f32 %v7755_v14, %v7756_v49  ;;  %v8257_v25 = vsub.f32 %v12900_v31, %v8165_v7 }
 0x27e   : > { %v7750_v28 = vsub.f32 %v7748_v2, %v7749_v10  ;;  %v15186_v50 = vpack.c.bf16 %v8165_v7, %v8162_v11  ;;  %v8250_v30 = vsub.f32 %v7637_v60, %v8162_v11  ;;  %v12903_v58 = vpop.f32.mrb[22].mxu0  ;;  %v15188_v56 = vpack.c.bf16 %v7756_v49, %v7749_v10 }
 0x27f   : > { %v8258_v57 = vand.u32 4294901760, %v8257_v25  ;;  %v8667_v36 = vand.u32 4294901760, %v12903_v58  ;;  %v7649_v38 = vpop.f32.mrb[23].mxu0  ;;  %v7758_v5 = vand.u32 4294901760, %v7757_v62 }
 0x280   : > { %12578 = vmatmul.mubr.f32.vlgmr.msra.gmra.mrb[8].mxu1 %v14862_v40  ;;  %v8251_v33 = vand.u32 4294901760, %v8250_v30  ;;  %v8664_v15 = vand.u32 4294901760, %v7649_v38  ;;  %v7751_v17 = vand.u32 4294901760, %v7750_v28  ;;  %v15191_v37 = vpack.c.bf16 %v8257_v25, %v8250_v30 }
 0x281   : > { %13405 = vmatpush3.bf16.msra.mxu1 %v15032_v39  ;;  %12584 = vmatprep.mubr.f32.mxu1 %v14769_v32  ;;  %v8259_v1 = vsub.f32 %v8257_v25, %v8258_v57  ;;  %v8759_v9 = vsub.f32 %v12903_v58, %v8667_v36 }
 0x282   : > { %13407 = vmatprep.subr.bf16.mxu1 %v15054_v18  ;;  %v8252_v53 = vsub.f32 %v8250_v30, %v8251_v33  ;;  %v15196_v29 = vpack.c.bf16 %v8667_v36, %v8664_v15  ;;  %v8752_v22 = vsub.f32 %v7649_v38, %v8664_v15  ;;  %v15198_v47 = vpack.c.bf16 %v7758_v5, %v7751_v17 }
 0x283   : > { %v8760_v48 = vand.u32 4294901760, %v8759_v9  ;;  %v8260_v55 = vand.u32 4294901760, %v8259_v1  ;;  %v15200_v61 = vpack.c.bf16 %v8258_v57, %v8251_v33 }
 0x284   : > { %12585 = vmatmul.mubr.f32.vlgmr.msra.gmra.mrb[10].mxu1 %v14885_v0  ;;  %v8753_v4 = vand.u32 4294901760, %v8752_v22  ;;  %v8253_v13 = vand.u32 4294901760, %v8252_v53  ;;  %v15203_v44 = vpack.c.bf16 %v8759_v9, %v8752_v22 }
 0x285   : > { %13409 = vmatpush3.bf16.msra.mxu1 %v15054_v18  ;;  %12591 = vmatprep.mubr.f32.mxu1 %v14757_v41  ;;  %v8761_v19 = vsub.f32 %v8759_v9, %v8760_v48 }
 0x286   : > { %13411 = vmatprep.subr.bf16.mxu1 %v15041_v54  ;;  %v8754_v23 = vsub.f32 %v8752_v22, %v8753_v4  ;;  %v15208_v3 = vpack.c.bf16 %v8260_v55, %v8253_v13  ;;  %v15210_v14 = vpack.c.bf16 %v8760_v48, %v8753_v4 }
 0x287   : > { %v8762_v2 = vand.u32 4294901760, %v8761_v19 }
 0x288   : > { %v8755_v31 = vand.u32 4294901760, %v8754_v23 }
 0x28a   : > { %v15212_v49 = vpack.c.bf16 %v8762_v2, %v8755_v31 }
 0x28c   : > { %12592 = vmatmul.mubr.f32.vlgmr.msra.gmra.mrb[10].mxu1 %v14862_v40 }
 0x28d   : > { %13413 = vmatpush3.bf16.msra.mxu1 %v15041_v54  ;;  %12598 = vmatprep.mubr.f32.mxu1 %v14760_v43 }
 0x28e   : > { %13415 = vmatprep.subr.bf16.mxu1 %v15032_v39 }
 0x294   : > { %12599 = vmatmul.mubr.f32.vlgmr.msra.gmra.mrb[10].mxu1 %v14867_v27 }
 0x295   : > { %13417 = vmatpush3.bf16.msra.mxu1 %v15032_v39  ;;  %12605 = vmatprep.mubr.f32.mxu1 %v14765_v45 }
 0x296   : > { %13419 = vmatprep.subr.bf16.mxu1 %v15048_v24 }
 0x29c   : > { %12606 = vmatmul.mubr.f32.vlgmr.msra.gmra.mrb[10].mxu1 %v14874_v42 }
 0x29d   : > { %13421 = vmatpush3.bf16.msra.mxu1 %v15048_v24  ;;  %12612 = vmatprep.mubr.f32.mxu1 %v14757_v41 }
 0x29e   : > { %13423 = vmatprep.subr.bf16.mxu1 %v15032_v39 }
 0x2a3   : > { %v15226_v54 = vpop.f32.mrb[0].mxu1 }
 0x2a4   : > { %v15228_v18 = vpop.f32.mrb[1].mxu1  ;;  %12613 = vmatmul.mubr.f32.vlgmr.msra.gmra.mrb[10].mxu1 %v14862_v40 }
 0x2a5   : > { %13425 = vmatpush3.bf16.msra.mxu1 %v15032_v39  ;;  %12619 = vmatprep.mubr.f32.mxu1 %v14757_v41 }
 0x2a6   : > { %13451 = vmatprep.subr.bf16.mxu1 %v15118_v63 }
 0x2ac   : > { %12620 = vmatmul.mubr.f32.vlgmr.msra.gmra.mrb[10].mxu1 %v14862_v40 }
 0x2ad   : > { %13453 = vmatpush3.bf16.msra.mxu1 %v15118_v63  ;;  %12704 = vmatprep.mubr.f32.mxu1 %v14769_v32 }
 0x2ae   : > { %13455 = vmatprep.subr.bf16.mxu1 %v15134_v26 }
 0x2b0   : > { %12705 = vmatmul.mubr.f32.vlgmr.msra.gmra.mrb[12].mxu1 %v14885_v0 }
 0x2b1   : > { %13457 = vmatpush3.bf16.msra.mxu1 %v15134_v26  ;;  %12711 = vmatprep.mubr.f32.mxu1 %v14757_v41 }
 0x2b2   : > { %13459 = vmatprep.subr.bf16.mxu1 %v15121_v51 }
 0x2b8   : > { %12712 = vmatmul.mubr.f32.vlgmr.msra.gmra.mrb[12].mxu1 %v14862_v40 }
 0x2b9   : > { %13461 = vmatpush3.bf16.msra.mxu1 %v15121_v51  ;;  %12718 = vmatprep.mubr.f32.mxu1 %v14760_v43 }
 0x2ba   : > { %13463 = vmatprep.subr.bf16.mxu1 %v15118_v63 }
 0x2c0   : > { %12719 = vmatmul.mubr.f32.vlgmr.msra.gmra.mrb[12].mxu1 %v14867_v27 }
 0x2c1   : > { %13465 = vmatpush3.bf16.msra.mxu1 %v15118_v63  ;;  %12725 = vmatprep.mubr.f32.mxu1 %v14765_v45 }
 0x2c2   : > { %13467 = vmatprep.subr.bf16.mxu1 %v15128_v34 }
 0x2c8   : > { %12726 = vmatmul.mubr.f32.vlgmr.msra.gmra.mrb[12].mxu1 %v14874_v42 }
 0x2c9   : > { %13469 = vmatpush3.bf16.msra.mxu1 %v15128_v34  ;;  %12732 = vmatprep.mubr.f32.mxu1 %v14757_v41 }
 0x2ca   : > { %13471 = vmatprep.subr.bf16.mxu1 %v15118_v63 }
 0x2cf   : > { %v15254_v39 = vpop.f32.mrb[2].mxu1 }
 0x2d0   : > { %v15256_v24 = vpop.f32.mrb[3].mxu1  ;;  %12733 = vmatmul.mubr.f32.vlgmr.msra.gmra.mrb[12].mxu1 %v14862_v40 }
 0x2d1   : > { %13473 = vmatpush3.bf16.msra.mxu1 %v15118_v63  ;;  %12739 = vmatprep.mubr.f32.mxu1 %v14757_v41 }
 0x2d2   : > { %13475 = vmatprep.subr.bf16.mxu1 %v15126_v8 }
 0x2d8   : > { %12740 = vmatmul.mubr.f32.vlgmr.msra.gmra.mrb[12].mxu1 %v14862_v40 }
 0x2d9   : > { %13477 = vmatpush3.bf16.msra.mxu1 %v15126_v8  ;;  %12746 = vmatprep.mubr.f32.mxu1 %v14769_v32 }
 0x2da   : > { %13479 = vmatprep.subr.bf16.mxu1 %v15144_v16 }
 0x2dc   : > { %12747 = vmatmul.mubr.f32.vlgmr.msra.gmra.mrb[14].mxu1 %v14885_v0 }
 0x2dd   : > { %13481 = vmatpush3.bf16.msra.mxu1 %v15144_v16  ;;  %12753 = vmatprep.mubr.f32.mxu1 %v14757_v41 }
 0x2de   : > { %13483 = vmatprep.subr.bf16.mxu1 %v15130_v35 }
 0x2e4   : > { %12754 = vmatmul.mubr.f32.vlgmr.msra.gmra.mrb[14].mxu1 %v14862_v40 }
 0x2e5   : > { %13485 = vmatpush3.bf16.msra.mxu1 %v15130_v35  ;;  %12760 = vmatprep.mubr.f32.mxu1 %v14760_v43 }
 0x2e6   : > { %13487 = vmatprep.subr.bf16.mxu1 %v15126_v8 }
 0x2ec   : > { %12761 = vmatmul.mubr.f32.vlgmr.msra.gmra.mrb[14].mxu1 %v14867_v27 }
 0x2ed   : > { %13489 = vmatpush3.bf16.msra.mxu1 %v15126_v8  ;;  %12767 = vmatprep.mubr.f32.mxu1 %v14765_v45 }
 0x2ee   : > { %13491 = vmatprep.subr.bf16.mxu1 %v15136_v46  ;;  %v13101_v63 = vpop.f32.mrb[24].mxu0 }
 0x2ef   : > { %v9873_v51 = vand.u32 4294901760, %v13101_v63  ;;  %v9835_v34 = vpop.f32.mrb[25].mxu0 }
 0x2f0   : > { %v9870_v26 = vand.u32 4294901760, %v9835_v34 }
 0x2f1   : > { %v9965_v16 = vsub.f32 %v13101_v63, %v9873_v51 }
 0x2f2   : > { %v15278_v7 = vpack.c.bf16 %v9873_v51, %v9870_v26  ;;  %v9958_v35 = vsub.f32 %v9835_v34, %v9870_v26  ;;  %v13104_v60 = vpop.f32.mrb[26].mxu0 }
 0x2f3   : > { %v9966_v10 = vand.u32 4294901760, %v9965_v16  ;;  %v10375_v11 = vand.u32 4294901760, %v13104_v60  ;;  %v9847_v62 = vpop.f32.mrb[27].mxu0 }
 0x2f4   : > { %12768 = vmatmul.mubr.f32.vlgmr.msra.gmra.mrb[14].mxu1 %v14874_v42  ;;  %v9959_v25 = vand.u32 4294901760, %v9958_v35  ;;  %v10372_v28 = vand.u32 4294901760, %v9847_v62  ;;  %v15286_v33 = vpack.c.bf16 %v9965_v16, %v9958_v35 }
 0x2f5   : > { %13493 = vmatpush3.bf16.msra.mxu1 %v15136_v46  ;;  %12774 = vmatprep.mubr.f32.mxu1 %v14757_v41  ;;  %v9967_v30 = vsub.f32 %v9965_v16, %v9966_v10  ;;  %v10467_v58 = vsub.f32 %v13104_v60, %v10375_v11 }
 0x2f6   : > { %13495 = vmatprep.subr.bf16.mxu1 %v15126_v8  ;;  %v9960_v57 = vsub.f32 %v9958_v35, %v9959_v25  ;;  %v15284_v36 = vpack.c.bf16 %v10375_v11, %v10372_v28  ;;  %v10460_v38 = vsub.f32 %v9847_v62, %v10372_v28  ;;  %v13107_v5 = vpop.f32.mrb[28].mxu0  ;;  %v15288_v4 = vpack.c.bf16 %v9966_v10, %v9959_v25 }
 0x2f7   : > { %v10468_v15 = vand.u32 4294901760, %v10467_v58  ;;  %v10877_v17 = vand.u32 4294901760, %v13107_v5  ;;  %v9859_v1 = vpop.f32.mrb[29].mxu0  ;;  %v9968_v46 = vand.u32 4294901760, %v9967_v30 }
 0x2f8   : > { %v10461_v9 = vand.u32 4294901760, %v10460_v38  ;;  %v10874_v53 = vand.u32 4294901760, %v9859_v1  ;;  %v9961_v22 = vand.u32 4294901760, %v9960_v57  ;;  %v15296_v51 = vpack.c.bf16 %v10467_v58, %v10460_v38 }
 0x2f9   : > { %v10469_v48 = vsub.f32 %v10467_v58, %v10468_v15  ;;  %v10969_v55 = vsub.f32 %v13107_v5, %v10877_v17 }
 0x2fa   : > { %v10462_v13 = vsub.f32 %v10460_v38, %v10461_v9  ;;  %v15290_v19 = vpack.c.bf16 %v10877_v17, %v10874_v53  ;;  %v10962_v23 = vsub.f32 %v9859_v1, %v10874_v53  ;;  %v15292_v2 = vpack.c.bf16 %v9968_v46, %v9961_v22 }
 0x2fb   : > { %v15294_v31 = vpop.f32.mrb[4].mxu1  ;;  %v10970_v63 = vand.u32 4294901760, %v10969_v55  ;;  %v10470_v35 = vand.u32 4294901760, %v10469_v48  ;;  %v15303_v10 = vpack.c.bf16 %v10468_v15, %v10461_v9 }
 0x2fc   : > { %v15298_v34 = vpop.f32.mrb[5].mxu1  ;;  %12775 = vmatmul.mubr.f32.vlgmr.msra.gmra.mrb[14].mxu1 %v14862_v40  ;;  %v10963_v26 = vand.u32 4294901760, %v10962_v23  ;;  %v10463_v16 = vand.u32 4294901760, %v10462_v13  ;;  %v15308_v25 = vpack.c.bf16 %v10969_v55, %v10962_v23 }
 0x2fd   : > { %13497 = vmatpush3.bf16.msra.mxu1 %v15126_v8  ;;  %12781 = vmatprep.mubr.f32.mxu1 %v14757_v41  ;;  %v10971_v60 = vsub.f32 %v10969_v55, %v10970_v63 }
 0x2fe   : > { %13499 = vmatprep.subr.bf16.mxu1 %v15132_v20  ;;  %v10964_v11 = vsub.f32 %v10962_v23, %v10963_v26  ;;  %v15306_v62 = vpack.c.bf16 %v10470_v35, %v10463_v16  ;;  %v15310_v58 = vpack.c.bf16 %v10970_v63, %v10963_v26 }
 0x2ff   : > { %v10972_v30 = vand.u32 4294901760, %v10971_v60 }
 0x300   : > { %v10965_v28 = vand.u32 4294901760, %v10964_v11 }
 0x302   : > { %v15312_v57 = vpack.c.bf16 %v10972_v30, %v10965_v28 }
 0x304   : > { %12782 = vmatmul.mubr.f32.vlgmr.msra.gmra.mrb[14].mxu1 %v14862_v40 }
 0x305   : > { %13501 = vmatpush3.bf16.msra.mxu1 %v15132_v20  ;;  %12788 = vmatprep.mubr.f32.mxu1 %v14769_v32 }
 0x306   : > { %13503 = vmatprep.subr.bf16.mxu1 %v15148_v59 }
 0x308   : > { %12789 = vmatmul.mubr.f32.vlgmr.msra.gmra.mrb[16].mxu1 %v14885_v0 }
 0x309   : > { %13505 = vmatpush3.bf16.msra.mxu1 %v15148_v59  ;;  %12795 = vmatprep.mubr.f32.mxu1 %v14757_v41 }
 0x30a   : > { %13507 = vmatprep.subr.bf16.mxu1 %v15139_v6 }
 0x310   : > { %12796 = vmatmul.mubr.f32.vlgmr.msra.gmra.mrb[16].mxu1 %v14862_v40 }
 0x311   : > { %13509 = vmatpush3.bf16.msra.mxu1 %v15139_v6  ;;  %12802 = vmatprep.mubr.f32.mxu1 %v14760_v43  ;;  %v15336_v6 = vmul.f32 %v15226_v54, %v15226_v54 }
 0x312   : > { %13511 = vmatprep.subr.bf16.mxu1 %v15132_v20 }
 0x318   : > { %12803 = vmatmul.mubr.f32.vlgmr.msra.gmra.mrb[16].mxu1 %v14867_v27 }
 0x319   : > { %13513 = vmatpush3.bf16.msra.mxu1 %v15132_v20  ;;  %12809 = vmatprep.mubr.f32.mxu1 %v14765_v45 }
 0x31a   : > { %13515 = vmatprep.subr.bf16.mxu1 %v15146_v52 }
 0x320   : > { %12810 = vmatmul.mubr.f32.vlgmr.msra.gmra.mrb[16].mxu1 %v14874_v42 }
 0x321   : > { %13517 = vmatpush3.bf16.msra.mxu1 %v15146_v52  ;;  %12816 = vmatprep.mubr.f32.mxu1 %v14757_v41  ;;  %v15346_v52 = vmul.f32 %v15228_v18, %v15228_v18 }
 0x322   : > { %13519 = vmatprep.subr.bf16.mxu1 %v15132_v20 }
 0x327   : > { %v12537_v8 = vpop.f32.mrb[6].mxu1 }
 0x328   : > { %v15339_v59 = vmul.f32 %v12537_v8, %v15226_v54  ;;  %v15341_v38 = vmul.f32 %v12537_v8, %v12537_v8  ;;  %v3689_v5 = vpop.f32.mrb[7].mxu1  ;;  %12817 = vmatmul.mubr.f32.vlgmr.msra.gmra.mrb[16].mxu1 %v14862_v40 }
 0x329   : > { %v15349_v15 = vmul.f32 %v3689_v5, %v15228_v18  ;;  %v15351_v17 = vmul.f32 %v3689_v5, %v3689_v5  ;;  %13521 = vmatpush3.bf16.msra.mxu1 %v15132_v20  ;;  %12823 = vmatprep.mubr.f32.mxu1 %v14757_v41 }
 0x32a   : > { %v15357_v54 = vadd.f32 %v15341_v38, %v15336_v6  ;;  %13547 = vmatprep.subr.bf16.mxu1 %v15182_v21 }
 0x32b   : > { %v15362_v1 = vadd.f32 %v15351_v17, %v15346_v52 }
 0x330   : > { %12824 = vmatmul.mubr.f32.vlgmr.msra.gmra.mrb[16].mxu1 %v14862_v40 }
 0x331   : > { %13549 = vmatpush3.bf16.msra.mxu1 %v15182_v21  ;;  %12908 = vmatprep.mubr.f32.mxu1 %v14769_v32 }
 0x332   : > { %13551 = vmatprep.subr.bf16.mxu1 %v15198_v47 }
 0x334   : > { %12909 = vmatmul.mubr.f32.vlgmr.msra.gmra.mrb[18].mxu1 %v14885_v0 }
 0x335   : > { %13553 = vmatpush3.bf16.msra.mxu1 %v15198_v47  ;;  %12915 = vmatprep.mubr.f32.mxu1 %v14757_v41 }
 0x336   : > { %13555 = vmatprep.subr.bf16.mxu1 %v15184_v12 }
 0x33c   : > { %12916 = vmatmul.mubr.f32.vlgmr.msra.gmra.mrb[18].mxu1 %v14862_v40 }
 0x33d   : > { %13557 = vmatpush3.bf16.msra.mxu1 %v15184_v12  ;;  %12922 = vmatprep.mubr.f32.mxu1 %v14760_v43  ;;  %v15386_v12 = vmul.f32 %v15254_v39, %v15254_v39 }
 0x33e   : > { %13559 = vmatprep.subr.bf16.mxu1 %v15182_v21 }
 0x344   : > { %12923 = vmatmul.mubr.f32.vlgmr.msra.gmra.mrb[18].mxu1 %v14867_v27 }
 0x345   : > { %13561 = vmatpush3.bf16.msra.mxu1 %v15182_v21  ;;  %12929 = vmatprep.mubr.f32.mxu1 %v14765_v45 }
 0x346   : > { %13563 = vmatprep.subr.bf16.mxu1 %v15188_v56 }
 0x34c   : > { %12930 = vmatmul.mubr.f32.vlgmr.msra.gmra.mrb[18].mxu1 %v14874_v42 }
 0x34d   : > { %13565 = vmatpush3.bf16.msra.mxu1 %v15188_v56  ;;  %12936 = vmatprep.mubr.f32.mxu1 %v14757_v41  ;;  %v15396_v56 = vmul.f32 %v15256_v24, %v15256_v24 }
 0x34e   : > { %13567 = vmatprep.subr.bf16.mxu1 %v15182_v21 }
 0x353   : > { %v12579_v20 = vpop.f32.mrb[8].mxu1 }
 0x354   : > { %v15389_v47 = vmul.f32 %v12579_v20, %v15254_v39  ;;  %v15391_v18 = vmul.f32 %v12579_v20, %v12579_v20  ;;  %v4191_v9 = vpop.f32.mrb[9].mxu1  ;;  %12937 = vmatmul.mubr.f32.vlgmr.msra.gmra.mrb[18].mxu1 %v14862_v40 }
 0x355   : > { %v15399_v53 = vmul.f32 %v4191_v9, %v15256_v24  ;;  %v15401_v22 = vmul.f32 %v4191_v9, %v4191_v9  ;;  %13569 = vmatpush3.bf16.msra.mxu1 %v15182_v21  ;;  %12943 = vmatprep.mubr.f32.mxu1 %v14757_v41 }
 0x356   : > { %v15407_v39 = vadd.f32 %v15391_v18, %v15386_v12  ;;  %13571 = vmatprep.subr.bf16.mxu1 %v15186_v50 }
 0x357   : > { %v15412_v46 = vadd.f32 %v15401_v22, %v15396_v56  ;;  %v6933_v5 = vmul.f32 2.0, %v15399_v53 }
 0x35c   : > { %12944 = vmatmul.mubr.f32.vlgmr.msra.gmra.mrb[18].mxu1 %v14862_v40 }
 0x35d   : > { %13573 = vmatpush3.bf16.msra.mxu1 %v15186_v50  ;;  %12950 = vmatprep.mubr.f32.mxu1 %v14769_v32 }
 0x35e   : > { %13575 = vmatprep.subr.bf16.mxu1 %v15208_v3 }
 0x360   : > { %12951 = vmatmul.mubr.f32.vlgmr.msra.gmra.mrb[20].mxu1 %v14885_v0 }
 0x361   : > { %13577 = vmatpush3.bf16.msra.mxu1 %v15208_v3  ;;  %12957 = vmatprep.mubr.f32.mxu1 %v14757_v41 }
 0x362   : > { %13579 = vmatprep.subr.bf16.mxu1 %v15191_v37 }
 0x368   : > { %12958 = vmatmul.mubr.f32.vlgmr.msra.gmra.mrb[20].mxu1 %v14862_v40 }
 0x369   : > { %13581 = vmatpush3.bf16.msra.mxu1 %v15191_v37  ;;  %12964 = vmatprep.mubr.f32.mxu1 %v14760_v43  ;;  %v15436_v37 = vmul.f32 %v15294_v31, %v15294_v31 }
 0x36a   : > { %13583 = vmatprep.subr.bf16.mxu1 %v15186_v50 }
 0x370   : > { %12965 = vmatmul.mubr.f32.vlgmr.msra.gmra.mrb[20].mxu1 %v14867_v27 }
 0x371   : > { %13585 = vmatpush3.bf16.msra.mxu1 %v15186_v50  ;;  %12971 = vmatprep.mubr.f32.mxu1 %v14765_v45 }
 0x372   : > { %13587 = vmatprep.subr.bf16.mxu1 %v15200_v61 }
 0x378   : > { %12972 = vmatmul.mubr.f32.vlgmr.msra.gmra.mrb[20].mxu1 %v14874_v42 }
 0x379   : > { %13589 = vmatpush3.bf16.msra.mxu1 %v15200_v61  ;;  %12978 = vmatprep.mubr.f32.mxu1 %v14757_v41  ;;  %v15446_v61 = vmul.f32 %v15298_v34, %v15298_v34 }
 0x37a   : > { %13591 = vmatprep.subr.bf16.mxu1 %v15186_v50 }
 0x37f   : > { %v12621_v21 = vpop.f32.mrb[10].mxu1 }
 0x380   : > { %v15439_v3 = vmul.f32 %v12621_v21, %v15294_v31  ;;  %v15441_v24 = vmul.f32 %v12621_v21, %v12621_v21  ;;  %v4693_v48 = vpop.f32.mrb[11].mxu1  ;;  %12979 = vmatmul.mubr.f32.vlgmr.msra.gmra.mrb[20].mxu1 %v14862_v40 }
 0x381   : > { %v15449_v55 = vmul.f32 %v4693_v48, %v15298_v34  ;;  %v15451_v13 = vmul.f32 %v4693_v48, %v4693_v48  ;;  %13593 = vmatpush3.bf16.msra.mxu1 %v15186_v50  ;;  %12985 = vmatprep.mubr.f32.mxu1 %v14757_v41  ;;  %v6931_v34 = vmul.f32 2.0, %v15349_v15  ;;  %v6939_v48 = vadd.f32 0.0001, %v6933_v5 }
 0x382   : > { %v15457_v23 = vadd.f32 %v15441_v24, %v15436_v37  ;;  %13595 = vmatprep.subr.bf16.mxu1 %v15196_v29 }
 0x383   : > { %v15462_v31 = vadd.f32 %v15451_v13, %v15446_v61  ;;  %v6937_v11 = vadd.f32 0.0001, %v6931_v34 }
 0x388   : > { %12986 = vmatmul.mubr.f32.vlgmr.msra.gmra.mrb[20].mxu1 %v14862_v40 }
 0x389   : > { %13597 = vmatpush3.bf16.msra.mxu1 %v15196_v29  ;;  %12992 = vmatprep.mubr.f32.mxu1 %v14769_v32 }
 0x38a   : > { %13599 = vmatprep.subr.bf16.mxu1 %v15212_v49 }
 0x38c   : > { %12993 = vmatmul.mubr.f32.vlgmr.msra.gmra.mrb[22].mxu1 %v14885_v0 }
 0x38d   : > { %13601 = vmatpush3.bf16.msra.mxu1 %v15212_v49  ;;  %12999 = vmatprep.mubr.f32.mxu1 %v14757_v41 }
 0x38e   : > { %13603 = vmatprep.subr.bf16.mxu1 %v15203_v44 }
 0x394   : > { %13000 = vmatmul.mubr.f32.vlgmr.msra.gmra.mrb[22].mxu1 %v14862_v40 }
 0x395   : > { %13605 = vmatpush3.bf16.msra.mxu1 %v15203_v44  ;;  %13006 = vmatprep.mubr.f32.mxu1 %v14760_v43  ;;  %v6932_v44 = vmul.f32 2.0, %v15339_v59 }
 0x396   : > { %13607 = vmatprep.subr.bf16.mxu1 %v15196_v29 }
 0x397   : > { %v6938_v35 = vadd.f32 0.0001, %v6932_v44 }
 0x39c   : > { %13007 = vmatmul.mubr.f32.vlgmr.msra.gmra.mrb[22].mxu1 %v14867_v27 }
 0x39d   : > { %13609 = vmatpush3.bf16.msra.mxu1 %v15196_v29  ;;  %13013 = vmatprep.mubr.f32.mxu1 %v14765_v45 }
 0x39e   : > { %13611 = vmatprep.subr.bf16.mxu1 %v15210_v14 }
 0x3a4   : > { %13014 = vmatmul.mubr.f32.vlgmr.msra.gmra.mrb[22].mxu1 %v14874_v42 }
 0x3a5   : > { %13613 = vmatpush3.bf16.msra.mxu1 %v15210_v14  ;;  %13020 = vmatprep.mubr.f32.mxu1 %v14757_v41 }
 0x3a6   : > { %13615 = vmatprep.subr.bf16.mxu1 %v15196_v29 }
 0x3ab   : > { %v12741_v50 = vpop.f32.mrb[12].mxu1 }
 0x3ac   : > { %v6926_v49 = vsub.f32 %v12741_v50, %v15339_v59  ;;  %v5911_v63 = vpop.f32.mrb[13].mxu1  ;;  %13021 = vmatmul.mubr.f32.vlgmr.msra.gmra.mrb[22].mxu1 %v14862_v40 }
 0x3ad   : > { %v6925_v26 = vsub.f32 %v5911_v63, %v15349_v15  ;;  %13617 = vmatpush3.bf16.msra.mxu1 %v15196_v29  ;;  %13027 = vmatprep.mubr.f32.mxu1 %v14757_v41 }
 0x3ae   : > { %v6944_v14 = vmul.f32 2.0, %v6926_v49  ;;  %13643 = vmatprep.subr.bf16.mxu1 %v15278_v7  ;;  %v6935_v49 = vmul.f32 2.0, %v15449_v55 }
 0x3af   : > { %v6943_v16 = vmul.f32 2.0, %v6925_v26 }
 0x3b0   : > { %v6950_v60 = vadd.f32 0.0009, %v6944_v14 }
 0x3b1   : > { %v6949_v28 = vadd.f32 0.0009, %v6943_v16  ;;  %v6941_v16 = vadd.f32 0.0001, %v6935_v49 }
 0x3b2   : > { %v15492_v30 = vmul.f32 %v6950_v60, %v6938_v35 }
 0x3b3   : > { %v15494_v8 = vmul.f32 %v6949_v28, %v6937_v11 }
 0x3b4   : > { %13028 = vmatmul.mubr.f32.vlgmr.msra.gmra.mrb[22].mxu1 %v14862_v40 }
 0x3b5   : > { %13645 = vmatpush3.bf16.msra.mxu1 %v15278_v7  ;;  %13112 = vmatprep.mubr.f32.mxu1 %v14769_v32 }
 0x3b6   : > { %13647 = vmatprep.subr.bf16.mxu1 %v15292_v2 }
 0x3b8   : > { %13113 = vmatmul.mubr.f32.vlgmr.msra.gmra.mrb[24].mxu1 %v14885_v0 }
 0x3b9   : > { %13649 = vmatpush3.bf16.msra.mxu1 %v15292_v2  ;;  %13119 = vmatprep.mubr.f32.mxu1 %v14757_v41 }
 0x3ba   : > { %13651 = vmatprep.subr.bf16.mxu1 %v15286_v33 }
 0x3c0   : > { %13120 = vmatmul.mubr.f32.vlgmr.msra.gmra.mrb[24].mxu1 %v14862_v40 }
 0x3c1   : > { %13653 = vmatpush3.bf16.msra.mxu1 %v15286_v33  ;;  %13126 = vmatprep.mubr.f32.mxu1 %v14760_v43  ;;  %v6934_v33 = vmul.f32 2.0, %v15389_v47 }
 0x3c2   : > { %13655 = vmatprep.subr.bf16.mxu1 %v15278_v7 }
 0x3c3   : > { %v6940_v9 = vadd.f32 0.0001, %v6934_v33  ;;  %v11387_v33 = vadd.f32 0.0001, %v15362_v1 }
 0x3c8   : > { %13127 = vmatmul.mubr.f32.vlgmr.msra.gmra.mrb[24].mxu1 %v14867_v27 }
 0x3c9   : > { %13657 = vmatpush3.bf16.msra.mxu1 %v15278_v7  ;;  %13133 = vmatprep.mubr.f32.mxu1 %v14765_v45 }
 0x3ca   : > { %13659 = vmatprep.subr.bf16.mxu1 %v15288_v4 }
 0x3d0   : > { %13134 = vmatmul.mubr.f32.vlgmr.msra.gmra.mrb[24].mxu1 %v14874_v42 }
 0x3d1   : > { %13661 = vmatpush3.bf16.msra.mxu1 %v15288_v4  ;;  %13140 = vmatprep.mubr.f32.mxu1 %v14757_v41 }
 0x3d2   : > { %13663 = vmatprep.subr.bf16.mxu1 %v15278_v7 }
 0x3d7   : > { %v12783_v29 = vpop.f32.mrb[14].mxu1 }
 0x3d8   : > { %v6928_v2 = vsub.f32 %v12783_v29, %v15389_v47  ;;  %v6413_v59 = vpop.f32.mrb[15].mxu1  ;;  %13141 = vmatmul.mubr.f32.vlgmr.msra.gmra.mrb[24].mxu1 %v14862_v40  ;;  %v11388_v29 = vadd.f32 0.0001, %v15357_v54 }
 0x3d9   : > { %v6927_v15 = vsub.f32 %v6413_v59, %v15399_v53  ;;  %13665 = vmatpush3.bf16.msra.mxu1 %v15278_v7  ;;  %13147 = vmatprep.mubr.f32.mxu1 %v14757_v41 }
 0x3da   : > { %v6946_v4 = vmul.f32 2.0, %v6928_v2  ;;  %13667 = vmatprep.subr.bf16.mxu1 %v15284_v36 }
 0x3db   : > { %v6945_v20 = vmul.f32 2.0, %v6927_v15 }
 0x3dc   : > { %v6952_v21 = vadd.f32 0.0009, %v6946_v4 }
 0x3dd   : > { %v6951_v50 = vadd.f32 0.0009, %v6945_v20 }
 0x3de   : > { %v15524_v47 = vmul.f32 %v6952_v21, %v6940_v9 }
 0x3df   : > { %v15526_v44 = vmul.f32 %v6951_v50, %v6939_v48  ;;  %v11390_v48 = vadd.f32 0.0001, %v15407_v39 }
 0x3e0   : > { %13148 = vmatmul.mubr.f32.vlgmr.msra.gmra.mrb[24].mxu1 %v14862_v40 }
 0x3e1   : > { %13669 = vmatpush3.bf16.msra.mxu1 %v15284_v36  ;;  %13154 = vmatprep.mubr.f32.mxu1 %v14769_v32 }
 0x3e2   : > { %13671 = vmatprep.subr.bf16.mxu1 %v15306_v62 }
 0x3e4   : > { %13155 = vmatmul.mubr.f32.vlgmr.msra.gmra.mrb[26].mxu1 %v14885_v0 }
 0x3e5   : > { %13673 = vmatpush3.bf16.msra.mxu1 %v15306_v62  ;;  %13161 = vmatprep.mubr.f32.mxu1 %v14757_v41 }
 0x3e6   : > { %13675 = vmatprep.subr.bf16.mxu1 %v15296_v51 }
 0x3ec   : > { %13162 = vmatmul.mubr.f32.vlgmr.msra.gmra.mrb[26].mxu1 %v14862_v40 }
 0x3ed   : > { %13677 = vmatpush3.bf16.msra.mxu1 %v15296_v51  ;;  %13168 = vmatprep.mubr.f32.mxu1 %v14760_v43  ;;  %v6936_v51 = vmul.f32 2.0, %v15439_v3 }
 0x3ee   : > { %13679 = vmatprep.subr.bf16.mxu1 %v15284_v36 }
 0x3ef   : > { %v6942_v26 = vadd.f32 0.0001, %v6936_v51 }
 0x3f4   : > { %13169 = vmatmul.mubr.f32.vlgmr.msra.gmra.mrb[26].mxu1 %v14867_v27 }
 0x3f5   : > { %13681 = vmatpush3.bf16.msra.mxu1 %v15284_v36  ;;  %13175 = vmatprep.mubr.f32.mxu1 %v14765_v45 }
 0x3f6   : > { %13683 = vmatprep.subr.bf16.mxu1 %v15303_v10 }
 0x3fc   : > { %13176 = vmatmul.mubr.f32.vlgmr.msra.gmra.mrb[26].mxu1 %v14874_v42 }
 0x3fd   : > { %13685 = vmatpush3.bf16.msra.mxu1 %v15303_v10  ;;  %13182 = vmatprep.mubr.f32.mxu1 %v14757_v41 }
 0x3fe   : > { %13687 = vmatprep.subr.bf16.mxu1 %v15284_v36 }
 0x403   : > { %v12825_v7 = vpop.f32.mrb[16].mxu1 }
 0x404   : > { %v6930_v62 = vsub.f32 %v12825_v7, %v15439_v3  ;;  %v6915_v53 = vpop.f32.mrb[17].mxu1  ;;  %13183 = vmatmul.mubr.f32.vlgmr.msra.gmra.mrb[26].mxu1 %v14862_v40 }
 0x405   : > { %v6929_v63 = vsub.f32 %v6915_v53, %v15449_v55  ;;  %13689 = vmatpush3.bf16.msra.mxu1 %v15284_v36  ;;  %13189 = vmatprep.mubr.f32.mxu1 %v14757_v41 }
 0x406   : > { %v6948_v10 = vmul.f32 2.0, %v6930_v62  ;;  %13691 = vmatprep.subr.bf16.mxu1 %v15290_v19 }
 0x407   : > { %v6947_v34 = vmul.f32 2.0, %v6929_v63 }
 0x408   : > { %v6954_v14 = vadd.f32 0.0009, %v6948_v10 }
 0x409   : > { %v6953_v35 = vadd.f32 0.0009, %v6947_v34 }
 0x40a   : > { %v15556_v3 = vmul.f32 %v6954_v14, %v6942_v26 }
 0x40b   : > { %v15558_v60 = vmul.f32 %v6953_v35, %v6941_v16  ;;  %v11392_v16 = vadd.f32 0.0001, %v15457_v23  ;;  %v11447_v23 = vlaneseq }
 0x40c   : > { %13190 = vmatmul.mubr.f32.vlgmr.msra.gmra.mrb[26].mxu1 %v14862_v40 }
 0x40d   : > { %13693 = vmatpush3.bf16.msra.mxu1 %v15290_v19  ;;  %13196 = vmatprep.mubr.f32.mxu1 %v14769_v32 }
 0x40e   : > { %13695 = vmatprep.subr.bf16.mxu1 %v15312_v57 }
 0x410   : > { %13197 = vmatmul.mubr.f32.vlgmr.msra.gmra.mrb[28].mxu1 %v14885_v0 }
 0x411   : > { %13697 = vmatpush3.bf16.msra.mxu1 %v15312_v57  ;;  %13203 = vmatprep.mubr.f32.mxu1 %v14757_v41 }
 0x412   : > { %13699 = vmatprep.subr.bf16.mxu1 %v15308_v25 }
 0x418   : > { %13204 = vmatmul.mubr.f32.vlgmr.msra.gmra.mrb[28].mxu1 %v14862_v40 }
 0x419   : > { %13701 = vmatpush3.bf16.msra.mxu1 %v15308_v25  ;;  %13210 = vmatprep.mubr.f32.mxu1 %v14760_v43 }
 0x41a   : > { %13703 = vmatprep.subr.bf16.mxu1 %v15290_v19 }
 0x420   : > { %13211 = vmatmul.mubr.f32.vlgmr.msra.gmra.mrb[28].mxu1 %v14867_v27 }
 0x421   : > { %13705 = vmatpush3.bf16.msra.mxu1 %v15290_v19  ;;  %13217 = vmatprep.mubr.f32.mxu1 %v14765_v45 }
 0x422   : > { %13707 = vmatprep.subr.bf16.mxu1 %v15310_v58 }
 0x428   : > { %13218 = vmatmul.mubr.f32.vlgmr.msra.gmra.mrb[28].mxu1 %v14874_v42 }
 0x429   : > { %13709 = vmatpush3.bf16.msra.mxu1 %v15310_v58  ;;  %13224 = vmatprep.mubr.f32.mxu1 %v14757_v41 }
 0x42a   : > { %13711 = vmatprep.subr.bf16.mxu1 %v15290_v19 }
 0x42f   : > { %v12945_v32 = vpop.f32.mrb[18].mxu1 }
 0x430   : > { %v9166_v43 = vsub.f32 %v12945_v32, %v15336_v6  ;;  %v8151_v0 = vpop.f32.mrb[19].mxu1  ;;  %13225 = vmatmul.mubr.f32.vlgmr.msra.gmra.mrb[28].mxu1 %v14862_v40 }
 0x431   : > { %v9165_v27 = vsub.f32 %v8151_v0, %v15346_v52  ;;  %13713 = vmatpush3.bf16.msra.mxu1 %v15290_v19  ;;  %13231 = vmatprep.mubr.f32.mxu1 %v14757_v41 }
 0x438   : > { %13232 = vmatmul.mubr.f32.vlgmr.msra.gmra.mrb[28].mxu1 %v14862_v40 }
 0x45b   : > { %v12987_v45 = vpop.f32.mrb[20].mxu1 }
 0x45c   : > { %v9168_v42 = vsub.f32 %v12987_v45, %v15386_v12  ;;  %v8653_v36 = vpop.f32.mrb[21].mxu1 }
 0x45d   : > { %v9167_v25 = vsub.f32 %v8653_v36, %v15396_v56 }
 0x487   : > { %v13029_v58 = vpop.f32.mrb[22].mxu1 }
 0x488   : > { %v9170_v57 = vsub.f32 %v13029_v58, %v15436_v37  ;;  %v9155_v6 = vpop.f32.mrb[23].mxu1  ;;  %v11450_v58 = vshrl.u32 %v11447_v23, 7 }
 0x489   : > { %v9169_v55 = vsub.f32 %v9155_v6, %v15446_v61 }
 0x4b3   : > { %v13149_v11 = vpop.f32.mrb[24].mxu1 }
 0x4b4   : > { %v11376_v52 = vsub.f32 %v13149_v11, %v15341_v38  ;;  %v10361_v19 = vpop.f32.mrb[25].mxu1 }
 0x4b5   : > { %v11375_v41 = vsub.f32 %v10361_v19, %v15351_v17 }
 0x4b6   : > { %v11394_v28 = vadd.f32 %v11376_v52, %v9166_v43 }
 0x4b7   : > { %v11393_v40 = vadd.f32 %v11375_v41, %v9165_v27 }
 0x4b8   : > { %v11400_v12 = vadd.f32 0.0009, %v11394_v28 }
 0x4b9   : > { %v11399_v56 = vadd.f32 0.0009, %v11393_v40 }
 0x4ba   : > { %v11406_v2 = vmul.f32 %v11400_v12, %v11388_v29 }
 0x4bb   : > { %v11405_v59 = vmul.f32 %v11399_v56, %v11387_v33 }
 0x4bc   : > { %14084 = vrcp.f32 %v11406_v2 }
 0x4bd   : > { %14086 = vrcp.f32 %v11405_v59 }
 0x4c6   : > { %v14085_v37 = vpop.eup %14084 }
 0x4c7   : > { %v14087_v61 = vpop.eup %14086  ;;  %v11414_v5 = vmul.f32 %v14085_v37, %v15492_v30  ;;  %v11389_v30 = vadd.f32 0.0001, %v15412_v46 }
 0x4c8   : > { %v11412_v38 = vmul.f32 %v14087_v61, %v15494_v8 }
 0x4c9   : > { %v11426_v17 = vsel %vm300_vm0, %v11414_v5, 0.0 }
 0x4ca   : > { %11427 = vadd.xlane.f32.xlu0 %v11426_v17  ;;  %v11423_v15 = vsel %vm300_vm0, %v11412_v38, 0.0 }
 0x4ce   : > { %11424 = vadd.xlane.f32.xlu0 %v11423_v15 }
 0x4df   : > { %v13191_v54 = vpop.f32.mrb[26].mxu1 }
 0x4e0   : > { %v11378_v1 = vsub.f32 %v13191_v54, %v15391_v18  ;;  %v10863_v4 = vpop.f32.mrb[27].mxu1 }
 0x4e1   : > { %v11377_v20 = vsub.f32 %v10863_v4, %v15401_v22 }
 0x4e2   : > { %v11396_v9 = vadd.f32 %v11378_v1, %v9168_v42 }
 0x4e3   : > { %v11395_v21 = vadd.f32 %v11377_v20, %v9167_v25 }
 0x4e4   : > { %v11402_v50 = vadd.f32 0.0009, %v11396_v9 }
 0x4e5   : > { %v11401_v8 = vadd.f32 0.0009, %v11395_v21 }
 0x4e6   : > { %v11408_v7 = vmul.f32 %v11402_v50, %v11390_v48 }
 0x4e7   : > { %v11407_v51 = vmul.f32 %v11401_v8, %v11389_v30 }
 0x4e8   : > { %14088 = vrcp.f32 %v11408_v7 }
 0x4e9   : > { %14090 = vrcp.f32 %v11407_v51 }
 0x4f2   : > { %v14089_v62 = vpop.eup %14088 }
 0x4f3   : > { %v14091_v53 = vpop.eup %14090  ;;  %v11418_v49 = vmul.f32 %v14089_v62, %v15524_v47  ;;  %v11391_v47 = vadd.f32 0.0001, %v15462_v31  ;;  %v11448_v31 = vand.u32 127, %v11447_v23 }
 0x4f4   : > { %v11416_v18 = vmul.f32 %v14091_v53, %v15526_v44 }
 0x4f5   : > { %v11432_v22 = vsel %vm300_vm0, %v11418_v49, 0.0 }
 0x4f6   : > { %11433 = vadd.xlane.f32.xlu1 %v11432_v22  ;;  %v11429_v63 = vsel %vm300_vm0, %v11416_v18, 0.0 }
 0x4fa   : > { %11430 = vadd.xlane.f32.xlu1 %v11429_v63 }
 0x50b   : > { %v13233_v39 = vpop.f32.mrb[28].mxu1 }
 0x50c   : > { %v11380_v46 = vsub.f32 %v13233_v39, %v15441_v24  ;;  %v11365_v10 = vpop.f32.mrb[29].mxu1 }
 0x50d   : > { %v11379_v34 = vsub.f32 %v11365_v10, %v15451_v13 }
 0x50e   : > { %v11398_v26 = vadd.f32 %v11380_v46, %v9170_v57  ;;  %v11453_v57 = vadd.s32 4294967288, %v11448_v31 }
 0x50f   : > { %v11397_v14 = vadd.f32 %v11379_v34, %v9169_v55  ;;  %v11451_v55 = vsub.s32 %v11448_v31, %v11450_v58 }
 0x510   : > { %v11404_v35 = vadd.f32 0.0009, %v11398_v26  ;;  %v11456_v52 = vsub.s32 %v11453_v57, %v11450_v58 }
 0x511   : > { %v11403_v44 = vadd.f32 0.0009, %v11397_v14 }
 0x512   : > { %v11410_v32 = vmul.f32 %v11404_v35, %v11392_v16 }
 0x513   : > { %v11409_v43 = vmul.f32 %v11403_v44, %v11391_v47 }
 0x514   : > { %14092 = vrcp.f32 %v11410_v32 }
 0x515   : > { %14094 = vrcp.f32 %v11409_v43 }
 0x51e   : > { %v14093_v0 = vpop.eup %14092 }
 0x51f   : > { %v14095_v27 = vpop.eup %14094  ;;  %v11422_v45 = vmul.f32 %v14093_v0, %v15556_v3 }
 0x520   : > { %v11420_v24 = vmul.f32 %v14095_v27, %v15558_v60 }
 0x521   : > { %v11438_v13 = vsel %vm300_vm0, %v11422_v45, 0.0 }
 0x522   : > { %11439 = vadd.xlane.f32.xlu1 %v11438_v13  ;;  %v11435_v42 = vsel %vm300_vm0, %v11420_v24, 0.0 }
 0x523   : > { %11436 = vadd.xlane.f32.xlu0 %v11435_v42 }
 0x557   : > { %v11428_v25 = vpop.xlane.xlu0 %11427 }
 0x558   : > { %v11457_v28 = vrot.slane %v11428_v25, %v11456_v52 }
 0x55b   : > { %v11425_v11 = vpop.xlane.xlu0 %11424 }
 0x55c   : > { %v11452_v3 = vrot.slane %v11425_v11, %v11451_v55 }
 0x55e   : > { %v11459_v56 = vsel %vm11458_vm1, %v11457_v28, %v11452_v3 }
 0x583   : > { %v11434_v36 = vpop.xlane.xlu1 %11433 }
 0x584   : > { %v11467_v41 = vrot.slane %v11434_v36, %v11456_v52 }
 0x587   : > { %v11431_v6 = vpop.xlane.xlu1 %11430 }
 0x588   : > { %v11463_v19 = vrot.slane %v11431_v6, %v11451_v55 }
 0x58a   : > { %v11468_v40 = vsel %vm11458_vm1, %v11467_v41, %v11463_v19 }
 0x58b   : > { %v11479_v59 = vsel %vm11478_vm2, %v11468_v40, %v11459_v56 }
 0x5af   : > { %v11440_v60 = vpop.xlane.xlu1 %11439 }
 0x5b0   : > { %v11476_v29 = vrot.slane %v11440_v60, %v11456_v52  ;;  %v11437_v12 = vpop.xlane.xlu0 %11436 }
 0x5b1   : > { %v11472_v33 = vrot.slane %v11437_v12, %v11451_v55 }
 0x5b3   : > { %v11477_v2 = vsel %vm11458_vm1, %v11476_v29, %v11472_v33 }
 0x5b4   : > { %v11481_v37 = vsel %vm11480_vm3, %v11477_v2, %v11479_v59 }
 0x5b5   : > { %v11484_v61 = vsel %vm11483_vm4, %v11481_v37, 0.0 }
 0x5b6   : > { %11485 = vadd.xlane.f32.xlu0 %v11484_v61 }
 0x643   : > { %v11486_v5 = vpop.xlane.xlu0 %11485 }
 0x644   : > { %11488 = vst.msk [vmem:[%s283_s29] sm:$0x7] %vm11487_vm5, %v11486_v5 }
 0x645 PF: > { %p13_p1 = scmp.ge.s32.totalorder %s14309_s20, 4   ;;  %s15656_s15 = smov %s14246_s16 }
 0x646   : > { %s15657_s16 = smov %s14250_s17  ;;  %s15658_s17 = smov %s14319_s23 }
 0x647   : > { %s15659_s18 = smov %s14309_s20  ;;  %15 = sbr.rel (!%p13_p1) target bundleno = 3 (0x3), region = 94 }
 0x64e   :  { %11508 = vsyncpa [#allocation3], 1 }
 0x64f   :  { %11510 = vsyncpa [#allocation3 + $0x1], 1 }
 0x650   :  { %11511 = vsyncpa [#allocation5], 1 }

</bundles_post_ra>
